<compile_context>
chip_gen: v7x
topology: tpu7x:2x2x1
jax: 0.10.0
libtpu: 0.0.40
codegen_flags: <defaults>
</compile_context>

<pallas_src>
import functools

import jax
import jax.numpy as jnp
import numpy as np
from jax.experimental import pallas as pl
from jax.experimental.pallas import tpu as pltpu


def _round_up(n, m):
    return ((n + m - 1) // m) * m


def _lstm_fc_kernel(x_ref, wih_ref, whh_ref, b_ref, wfc_ref, bfc_ref, out_ref,
                    *, seq_len, batch):
    """Single-invocation LSTM recurrence + fused final FC.

    x_ref   : (S*Bp, I)   time-major, row index = t*Bp + b
    wih_ref : (I, 4*Hp)   gate-padded input weights
    whh_ref : (Hp, 4*Hp)  gate-padded recurrent weights
    b_ref   : (1, 4*Hp)   combined (b_ih + b_hh), gate-padded
    wfc_ref : (Hp, Op)    padded FC weights
    bfc_ref : (1, Op)     padded FC bias
    out_ref : (Bp, Op)    lane-dense padded output
    """
    Hp = whh_ref.shape[0]  # lane-padded hidden size (multiple of 128)

    # ---- Prologue: input projection for ALL timesteps in one MXU matmul ----
    gin = (jnp.dot(x_ref[...], wih_ref[...],
                   preferred_element_type=jnp.float32)
           + b_ref[...])                                    # (S*Bp, 4*Hp)

    h = jnp.zeros((batch, Hp), jnp.float32)
    c = jnp.zeros((batch, Hp), jnp.float32)

    # ---- Serial recurrence, fully unrolled (trace-time constant S). ----
    # Only h @ Whh + element-wise gate math is on the serial critical path.
    for t in range(seq_len):
        gates = (gin[t * batch:(t + 1) * batch, :]
                 + jnp.dot(h, whh_ref[...],
                           preferred_element_type=jnp.float32))  # (Bp, 4*Hp)
        # 128-lane-aligned gate slabs -> pure VPU/EUP work, no lane shuffles.
        i_g = jax.nn.sigmoid(gates[:, 0 * Hp:1 * Hp])
        f_g = jax.nn.sigmoid(gates[:, 1 * Hp:2 * Hp])
        g_g = jnp.tanh(gates[:, 2 * Hp:3 * Hp])
        o_g = jax.nn.sigmoid(gates[:, 3 * Hp:4 * Hp])
        c = f_g * c + i_g * g_g
        h = o_g * jnp.tanh(c)

    # ---- Fused FC on the last hidden state; lane-dense padded store. ----
    out_ref[...] = (jnp.dot(h, wfc_ref[...],
                            preferred_element_type=jnp.float32)
                    + bfc_ref[...]).astype(out_ref.dtype)


def direction_prediction_forward(x, params):
    """x: (B, S, I) float32.  Returns (B, output_dim) float32."""
    B, S, I = x.shape
    wih, whh, b = params["wih"], params["whh"], params["b"]
    wfc, bfc = params["wfc"], params["bfc"]
    H = whh.shape[0]
    O = wfc.shape[1]
    Hp = _round_up(H, 128)        # per-gate lane slab
    Op = _round_up(O, 128)        # lane-dense output
    Bp = _round_up(max(B, 8), 8)  # sublane-aligned batch rows

    # Gate-wise lane padding: each gate gets its own 128-aligned slab.
    # Padded weight/bias columns are zero so padded h/c lanes stay exactly 0.
    wih_p = jnp.pad(wih.reshape(I, 4, H),
                    ((0, 0), (0, 0), (0, Hp - H))).reshape(I, 4 * Hp)
    whh_p = jnp.pad(whh.reshape(H, 4, H),
                    ((0, Hp - H), (0, 0), (0, Hp - H))).reshape(Hp, 4 * Hp)
    b_p = jnp.pad(b.reshape(1, 4, H),
                  ((0, 0), (0, 0), (0, Hp - H))).reshape(1, 4 * Hp)
    wfc_p = jnp.pad(wfc, ((0, Hp - H), (0, Op - O)))
    bfc_p = jnp.pad(bfc, ((0, 0), (0, Op - O)))

    # Time-major + batch-row padding so one matmul covers all timesteps and
    # each per-step slice starts on an 8-sublane boundary: row = t*Bp + b.
    x_tm = jnp.transpose(x, (1, 0, 2))                       # (S, B, I)
    x_tm = jnp.pad(x_tm, ((0, 0), (0, Bp - B), (0, 0)))      # (S, Bp, I)
    x2d = x_tm.reshape(S * Bp, I)

    kernel = functools.partial(_lstm_fc_kernel, seq_len=S, batch=Bp)
    vmem_spec = pl.BlockSpec(memory_space=pltpu.MemorySpace.VMEM)

    out_padded = pl.pallas_call(
        kernel,
        out_shape=jax.ShapeDtypeStruct((Bp, Op), jnp.float32),
        in_specs=[vmem_spec] * 6,   # whole arrays resident in VMEM, loaded once
        out_specs=vmem_spec,
    )(x2d, wih_p, whh_p, b_p, wfc_p, bfc_p)

    return out_padded[:B, :O]


def init_params(key, input_dim, hidden_dim, output_dim):
    """Deterministic synthetic parameters (PyTorch-style uniform init)."""
    ks = jax.random.split(key, 6)
    bound = 1.0 / np.sqrt(hidden_dim)
    u = lambda k, shape: jax.random.uniform(k, shape, jnp.float32, -bound, bound)
    w_ih = u(ks[0], (4 * hidden_dim, input_dim))    # PyTorch layout
    w_hh = u(ks[1], (4 * hidden_dim, hidden_dim))
    b_ih = u(ks[2], (4 * hidden_dim,))
    b_hh = u(ks[3], (4 * hidden_dim,))
    w_fc = u(ks[4], (output_dim, hidden_dim))
    b_fc = u(ks[5], (output_dim,))
    return {
        "wih": jnp.transpose(w_ih),                 # (I, 4H)
        "whh": jnp.transpose(w_hh),                 # (H, 4H)
        "b": (b_ih + b_hh).reshape(1, -1),          # (1, 4H)
        "wfc": jnp.transpose(w_fc),                 # (H, O)
        "bfc": b_fc.reshape(1, -1),                 # (1, O)
    }


def reference_forward(x, params):
    """Pure-JAX reference matching PyTorch nn.LSTM + Linear semantics."""
    B, S, I = x.shape
    H = params["whh"].shape[0]

    def step(carry, x_t):
        h, c = carry
        gates = x_t @ params["wih"] + h @ params["whh"] + params["b"]
        i = jax.nn.sigmoid(gates[:, 0 * H:1 * H])
        f = jax.nn.sigmoid(gates[:, 1 * H:2 * H])
        g = jnp.tanh(gates[:, 2 * H:3 * H])
        o = jax.nn.sigmoid(gates[:, 3 * H:4 * H])
        c = f * c + i * g
        h = o * jnp.tanh(c)
        return (h, c), None

    h0 = jnp.zeros((B, H), jnp.float32)
    c0 = jnp.zeros((B, H), jnp.float32)
    (h_last, _), _ = jax.lax.scan(step, (h0, c0), jnp.swapaxes(x, 0, 1))
    return h_last @ params["wfc"] + params["bfc"]


if __name__ == "__main__":
    key = jax.random.PRNGKey(0)
    k_x, k_p = jax.random.split(key)

    batch, seq, input_dim, hidden_dim, output_dim = 2, 8, 8, 32, 3

    x = jax.random.normal(k_x, (batch, seq, input_dim), jnp.float32)
    params = init_params(k_p, input_dim, hidden_dim, output_dim)

    out = jax.block_until_ready(direction_prediction_forward(x, params))

    ref = jax.block_until_ready(reference_forward(x, params))
    np.testing.assert_allclose(np.asarray(out), np.asarray(ref),
                               rtol=1e-5, atol=1e-5)
    print("KERNEL_OK")
</pallas_src>

<mosaic_0001>
module attributes {stable_mosaic.version = 11 : i64} {
  func.func @_lstm_fc_kernel(%arg0: memref<64x8xf32, #tpu.memory_space<vmem>>, %arg1: memref<8x512xf32, #tpu.memory_space<vmem>>, %arg2: memref<128x512xf32, #tpu.memory_space<vmem>>, %arg3: memref<1x512xf32, #tpu.memory_space<vmem>>, %arg4: memref<128x128xf32, #tpu.memory_space<vmem>>, %arg5: memref<1x128xf32, #tpu.memory_space<vmem>>, %arg6: memref<8x128xf32, #tpu.memory_space<vmem>>) attributes {dimension_semantics = [], scalar_prefetch = 0 : i64, scratch_operands = 0 : i64, tpu.core_type = #tpu.core_type<tc>} {
    %c0 = arith.constant 0 : index
    %c0_0 = arith.constant 0 : index
    %0 = vector.load %arg0[%c0, %c0_0] : memref<64x8xf32, #tpu.memory_space<vmem>>, vector<64x8xf32>
    %c0_1 = arith.constant 0 : index
    %c0_2 = arith.constant 0 : index
    %1 = vector.load %arg1[%c0_1, %c0_2] : memref<8x512xf32, #tpu.memory_space<vmem>>, vector<8x512xf32>
    %cst = arith.constant dense<0.000000e+00> : vector<64x512xf32>
    %2 = tpu.matmul %0, %1, %cst {dimension_numbers = #tpu.dot_dimension_numbers<[1], [0], [0], [1], [0, 0, 1, 1], [], []>} : vector<64x8xf32>, vector<8x512xf32>, vector<64x512xf32> -> vector<64x512xf32>
    %c0_3 = arith.constant 0 : index
    %c0_4 = arith.constant 0 : index
    %3 = vector.load %arg3[%c0_3, %c0_4] : memref<1x512xf32, #tpu.memory_space<vmem>>, vector<1x512xf32>
    %4 = vector.broadcast %3 : vector<1x512xf32> to vector<64x512xf32>
    %5 = arith.addf %2, %4 : vector<64x512xf32>
    %cst_5 = arith.constant 0.000000e+00 : f32
    %6 = vector.broadcast %cst_5 : f32 to vector<8x128xf32>
    %cst_6 = arith.constant 0.000000e+00 : f32
    %7 = vector.broadcast %cst_6 : f32 to vector<8x128xf32>
    %8 = vector.extract_strided_slice %5 {offsets = [0, 0], sizes = [8, 512], strides = [1, 1]} : vector<64x512xf32> to vector<8x512xf32>
    %c0_7 = arith.constant 0 : index
    %c0_8 = arith.constant 0 : index
    %9 = vector.load %arg2[%c0_7, %c0_8] : memref<128x512xf32, #tpu.memory_space<vmem>>, vector<128x512xf32>
    %cst_9 = arith.constant dense<0.000000e+00> : vector<8x512xf32>
    %10 = tpu.matmul %6, %9, %cst_9 {dimension_numbers = #tpu.dot_dimension_numbers<[1], [0], [0], [1], [0, 0, 1, 1], [], []>} : vector<8x128xf32>, vector<128x512xf32>, vector<8x512xf32> -> vector<8x512xf32>
    %11 = arith.addf %8, %10 : vector<8x512xf32>
    %12 = vector.extract_strided_slice %11 {offsets = [0, 0], sizes = [8, 128], strides = [1, 1]} : vector<8x512xf32> to vector<8x128xf32>
    %13 = arith.negf %12 : vector<8x128xf32>
    %14 = math.exp %13 : vector<8x128xf32>
    %cst_10 = arith.constant 1.000000e+00 : f32
    %15 = vector.broadcast %cst_10 : f32 to vector<8x128xf32>
    %16 = arith.addf %15, %14 : vector<8x128xf32>
    %17 = arith.divf %15, %16 : vector<8x128xf32>
    %18 = vector.extract_strided_slice %11 {offsets = [0, 128], sizes = [8, 128], strides = [1, 1]} : vector<8x512xf32> to vector<8x128xf32>
    %19 = arith.negf %18 : vector<8x128xf32>
    %20 = math.exp %19 : vector<8x128xf32>
    %cst_11 = arith.constant 1.000000e+00 : f32
    %21 = vector.broadcast %cst_11 : f32 to vector<8x128xf32>
    %22 = arith.addf %21, %20 : vector<8x128xf32>
    %23 = arith.divf %21, %22 : vector<8x128xf32>
    %24 = vector.extract_strided_slice %11 {offsets = [0, 256], sizes = [8, 128], strides = [1, 1]} : vector<8x512xf32> to vector<8x128xf32>
    %25 = math.tanh %24 : vector<8x128xf32>
    %26 = vector.extract_strided_slice %11 {offsets = [0, 384], sizes = [8, 128], strides = [1, 1]} : vector<8x512xf32> to vector<8x128xf32>
    %27 = arith.negf %26 : vector<8x128xf32>
    %28 = math.exp %27 : vector<8x128xf32>
    %cst_12 = arith.constant 1.000000e+00 : f32
    %29 = vector.broadcast %cst_12 : f32 to vector<8x128xf32>
    %30 = arith.addf %29, %28 : vector<8x128xf32>
    %31 = arith.divf %29, %30 : vector<8x128xf32>
    %32 = arith.mulf %23, %7 : vector<8x128xf32>
    %33 = arith.mulf %17, %25 : vector<8x128xf32>
    %34 = arith.addf %32, %33 : vector<8x128xf32>
    %35 = math.tanh %34 : vector<8x128xf32>
    %36 = arith.mulf %31, %35 : vector<8x128xf32>
    %37 = vector.extract_strided_slice %5 {offsets = [8, 0], sizes = [8, 512], strides = [1, 1]} : vector<64x512xf32> to vector<8x512xf32>
    %c0_13 = arith.constant 0 : index
    %c0_14 = arith.constant 0 : index
    %38 = vector.load %arg2[%c0_13, %c0_14] : memref<128x512xf32, #tpu.memory_space<vmem>>, vector<128x512xf32>
    %cst_15 = arith.constant dense<0.000000e+00> : vector<8x512xf32>
    %39 = tpu.matmul %36, %38, %cst_15 {dimension_numbers = #tpu.dot_dimension_numbers<[1], [0], [0], [1], [0, 0, 1, 1], [], []>} : vector<8x128xf32>, vector<128x512xf32>, vector<8x512xf32> -> vector<8x512xf32>
    %40 = arith.addf %37, %39 : vector<8x512xf32>
    %41 = vector.extract_strided_slice %40 {offsets = [0, 0], sizes = [8, 128], strides = [1, 1]} : vector<8x512xf32> to vector<8x128xf32>
    %42 = arith.negf %41 : vector<8x128xf32>
    %43 = math.exp %42 : vector<8x128xf32>
    %cst_16 = arith.constant 1.000000e+00 : f32
    %44 = vector.broadcast %cst_16 : f32 to vector<8x128xf32>
    %45 = arith.addf %44, %43 : vector<8x128xf32>
    %46 = arith.divf %44, %45 : vector<8x128xf32>
    %47 = vector.extract_strided_slice %40 {offsets = [0, 128], sizes = [8, 128], strides = [1, 1]} : vector<8x512xf32> to vector<8x128xf32>
    %48 = arith.negf %47 : vector<8x128xf32>
    %49 = math.exp %48 : vector<8x128xf32>
    %cst_17 = arith.constant 1.000000e+00 : f32
    %50 = vector.broadcast %cst_17 : f32 to vector<8x128xf32>
    %51 = arith.addf %50, %49 : vector<8x128xf32>
    %52 = arith.divf %50, %51 : vector<8x128xf32>
    %53 = vector.extract_strided_slice %40 {offsets = [0, 256], sizes = [8, 128], strides = [1, 1]} : vector<8x512xf32> to vector<8x128xf32>
    %54 = math.tanh %53 : vector<8x128xf32>
    %55 = vector.extract_strided_slice %40 {offsets = [0, 384], sizes = [8, 128], strides = [1, 1]} : vector<8x512xf32> to vector<8x128xf32>
    %56 = arith.negf %55 : vector<8x128xf32>
    %57 = math.exp %56 : vector<8x128xf32>
    %cst_18 = arith.constant 1.000000e+00 : f32
    %58 = vector.broadcast %cst_18 : f32 to vector<8x128xf32>
    %59 = arith.addf %58, %57 : vector<8x128xf32>
    %60 = arith.divf %58, %59 : vector<8x128xf32>
    %61 = arith.mulf %52, %34 : vector<8x128xf32>
    %62 = arith.mulf %46, %54 : vector<8x128xf32>
    %63 = arith.addf %61, %62 : vector<8x128xf32>
    %64 = math.tanh %63 : vector<8x128xf32>
    %65 = arith.mulf %60, %64 : vector<8x128xf32>
    %66 = vector.extract_strided_slice %5 {offsets = [16, 0], sizes = [8, 512], strides = [1, 1]} : vector<64x512xf32> to vector<8x512xf32>
    %c0_19 = arith.constant 0 : index
    %c0_20 = arith.constant 0 : index
    %67 = vector.load %arg2[%c0_19, %c0_20] : memref<128x512xf32, #tpu.memory_space<vmem>>, vector<128x512xf32>
    %cst_21 = arith.constant dense<0.000000e+00> : vector<8x512xf32>
    %68 = tpu.matmul %65, %67, %cst_21 {dimension_numbers = #tpu.dot_dimension_numbers<[1], [0], [0], [1], [0, 0, 1, 1], [], []>} : vector<8x128xf32>, vector<128x512xf32>, vector<8x512xf32> -> vector<8x512xf32>
    %69 = arith.addf %66, %68 : vector<8x512xf32>
    %70 = vector.extract_strided_slice %69 {offsets = [0, 0], sizes = [8, 128], strides = [1, 1]} : vector<8x512xf32> to vector<8x128xf32>
    %71 = arith.negf %70 : vector<8x128xf32>
    %72 = math.exp %71 : vector<8x128xf32>
    %cst_22 = arith.constant 1.000000e+00 : f32
    %73 = vector.broadcast %cst_22 : f32 to vector<8x128xf32>
    %74 = arith.addf %73, %72 : vector<8x128xf32>
    %75 = arith.divf %73, %74 : vector<8x128xf32>
    %76 = vector.extract_strided_slice %69 {offsets = [0, 128], sizes = [8, 128], strides = [1, 1]} : vector<8x512xf32> to vector<8x128xf32>
    %77 = arith.negf %76 : vector<8x128xf32>
    %78 = math.exp %77 : vector<8x128xf32>
    %cst_23 = arith.constant 1.000000e+00 : f32
    %79 = vector.broadcast %cst_23 : f32 to vector<8x128xf32>
    %80 = arith.addf %79, %78 : vector<8x128xf32>
    %81 = arith.divf %79, %80 : vector<8x128xf32>
    %82 = vector.extract_strided_slice %69 {offsets = [0, 256], sizes = [8, 128], strides = [1, 1]} : vector<8x512xf32> to vector<8x128xf32>
    %83 = math.tanh %82 : vector<8x128xf32>
    %84 = vector.extract_strided_slice %69 {offsets = [0, 384], sizes = [8, 128], strides = [1, 1]} : vector<8x512xf32> to vector<8x128xf32>
    %85 = arith.negf %84 : vector<8x128xf32>
    %86 = math.exp %85 : vector<8x128xf32>
    %cst_24 = arith.constant 1.000000e+00 : f32
    %87 = vector.broadcast %cst_24 : f32 to vector<8x128xf32>
    %88 = arith.addf %87, %86 : vector<8x128xf32>
    %89 = arith.divf %87, %88 : vector<8x128xf32>
    %90 = arith.mulf %81, %63 : vector<8x128xf32>
    %91 = arith.mulf %75, %83 : vector<8x128xf32>
    %92 = arith.addf %90, %91 : vector<8x128xf32>
    %93 = math.tanh %92 : vector<8x128xf32>
    %94 = arith.mulf %89, %93 : vector<8x128xf32>
    %95 = vector.extract_strided_slice %5 {offsets = [24, 0], sizes = [8, 512], strides = [1, 1]} : vector<64x512xf32> to vector<8x512xf32>
    %c0_25 = arith.constant 0 : index
    %c0_26 = arith.constant 0 : index
    %96 = vector.load %arg2[%c0_25, %c0_26] : memref<128x512xf32, #tpu.memory_space<vmem>>, vector<128x512xf32>
    %cst_27 = arith.constant dense<0.000000e+00> : vector<8x512xf32>
    %97 = tpu.matmul %94, %96, %cst_27 {dimension_numbers = #tpu.dot_dimension_numbers<[1], [0], [0], [1], [0, 0, 1, 1], [], []>} : vector<8x128xf32>, vector<128x512xf32>, vector<8x512xf32> -> vector<8x512xf32>
    %98 = arith.addf %95, %97 : vector<8x512xf32>
    %99 = vector.extract_strided_slice %98 {offsets = [0, 0], sizes = [8, 128], strides = [1, 1]} : vector<8x512xf32> to vector<8x128xf32>
    %100 = arith.negf %99 : vector<8x128xf32>
    %101 = math.exp %100 : vector<8x128xf32>
    %cst_28 = arith.constant 1.000000e+00 : f32
    %102 = vector.broadcast %cst_28 : f32 to vector<8x128xf32>
    %103 = arith.addf %102, %101 : vector<8x128xf32>
    %104 = arith.divf %102, %103 : vector<8x128xf32>
    %105 = vector.extract_strided_slice %98 {offsets = [0, 128], sizes = [8, 128], strides = [1, 1]} : vector<8x512xf32> to vector<8x128xf32>
    %106 = arith.negf %105 : vector<8x128xf32>
    %107 = math.exp %106 : vector<8x128xf32>
    %cst_29 = arith.constant 1.000000e+00 : f32
    %108 = vector.broadcast %cst_29 : f32 to vector<8x128xf32>
    %109 = arith.addf %108, %107 : vector<8x128xf32>
    %110 = arith.divf %108, %109 : vector<8x128xf32>
    %111 = vector.extract_strided_slice %98 {offsets = [0, 256], sizes = [8, 128], strides = [1, 1]} : vector<8x512xf32> to vector<8x128xf32>
    %112 = math.tanh %111 : vector<8x128xf32>
    %113 = vector.extract_strided_slice %98 {offsets = [0, 384], sizes = [8, 128], strides = [1, 1]} : vector<8x512xf32> to vector<8x128xf32>
    %114 = arith.negf %113 : vector<8x128xf32>
    %115 = math.exp %114 : vector<8x128xf32>
    %cst_30 = arith.constant 1.000000e+00 : f32
    %116 = vector.broadcast %cst_30 : f32 to vector<8x128xf32>
    %117 = arith.addf %116, %115 : vector<8x128xf32>
    %118 = arith.divf %116, %117 : vector<8x128xf32>
    %119 = arith.mulf %110, %92 : vector<8x128xf32>
    %120 = arith.mulf %104, %112 : vector<8x128xf32>
    %121 = arith.addf %119, %120 : vector<8x128xf32>
    %122 = math.tanh %121 : vector<8x128xf32>
    %123 = arith.mulf %118, %122 : vector<8x128xf32>
    %124 = vector.extract_strided_slice %5 {offsets = [32, 0], sizes = [8, 512], strides = [1, 1]} : vector<64x512xf32> to vector<8x512xf32>
    %c0_31 = arith.constant 0 : index
    %c0_32 = arith.constant 0 : index
    %125 = vector.load %arg2[%c0_31, %c0_32] : memref<128x512xf32, #tpu.memory_space<vmem>>, vector<128x512xf32>
    %cst_33 = arith.constant dense<0.000000e+00> : vector<8x512xf32>
    %126 = tpu.matmul %123, %125, %cst_33 {dimension_numbers = #tpu.dot_dimension_numbers<[1], [0], [0], [1], [0, 0, 1, 1], [], []>} : vector<8x128xf32>, vector<128x512xf32>, vector<8x512xf32> -> vector<8x512xf32>
    %127 = arith.addf %124, %126 : vector<8x512xf32>
    %128 = vector.extract_strided_slice %127 {offsets = [0, 0], sizes = [8, 128], strides = [1, 1]} : vector<8x512xf32> to vector<8x128xf32>
    %129 = arith.negf %128 : vector<8x128xf32>
    %130 = math.exp %129 : vector<8x128xf32>
    %cst_34 = arith.constant 1.000000e+00 : f32
    %131 = vector.broadcast %cst_34 : f32 to vector<8x128xf32>
    %132 = arith.addf %131, %130 : vector<8x128xf32>
    %133 = arith.divf %131, %132 : vector<8x128xf32>
    %134 = vector.extract_strided_slice %127 {offsets = [0, 128], sizes = [8, 128], strides = [1, 1]} : vector<8x512xf32> to vector<8x128xf32>
    %135 = arith.negf %134 : vector<8x128xf32>
    %136 = math.exp %135 : vector<8x128xf32>
    %cst_35 = arith.constant 1.000000e+00 : f32
    %137 = vector.broadcast %cst_35 : f32 to vector<8x128xf32>
    %138 = arith.addf %137, %136 : vector<8x128xf32>
    %139 = arith.divf %137, %138 : vector<8x128xf32>
    %140 = vector.extract_strided_slice %127 {offsets = [0, 256], sizes = [8, 128], strides = [1, 1]} : vector<8x512xf32> to vector<8x128xf32>
    %141 = math.tanh %140 : vector<8x128xf32>
    %142 = vector.extract_strided_slice %127 {offsets = [0, 384], sizes = [8, 128], strides = [1, 1]} : vector<8x512xf32> to vector<8x128xf32>
    %143 = arith.negf %142 : vector<8x128xf32>
    %144 = math.exp %143 : vector<8x128xf32>
    %cst_36 = arith.constant 1.000000e+00 : f32
    %145 = vector.broadcast %cst_36 : f32 to vector<8x128xf32>
    %146 = arith.addf %145, %144 : vector<8x128xf32>
    %147 = arith.divf %145, %146 : vector<8x128xf32>
    %148 = arith.mulf %139, %121 : vector<8x128xf32>
    %149 = arith.mulf %133, %141 : vector<8x128xf32>
    %150 = arith.addf %148, %149 : vector<8x128xf32>
    %151 = math.tanh %150 : vector<8x128xf32>
    %152 = arith.mulf %147, %151 : vector<8x128xf32>
    %153 = vector.extract_strided_slice %5 {offsets = [40, 0], sizes = [8, 512], strides = [1, 1]} : vector<64x512xf32> to vector<8x512xf32>
    %c0_37 = arith.constant 0 : index
    %c0_38 = arith.constant 0 : index
    %154 = vector.load %arg2[%c0_37, %c0_38] : memref<128x512xf32, #tpu.memory_space<vmem>>, vector<128x512xf32>
    %cst_39 = arith.constant dense<0.000000e+00> : vector<8x512xf32>
    %155 = tpu.matmul %152, %154, %cst_39 {dimension_numbers = #tpu.dot_dimension_numbers<[1], [0], [0], [1], [0, 0, 1, 1], [], []>} : vector<8x128xf32>, vector<128x512xf32>, vector<8x512xf32> -> vector<8x512xf32>
    %156 = arith.addf %153, %155 : vector<8x512xf32>
    %157 = vector.extract_strided_slice %156 {offsets = [0, 0], sizes = [8, 128], strides = [1, 1]} : vector<8x512xf32> to vector<8x128xf32>
    %158 = arith.negf %157 : vector<8x128xf32>
    %159 = math.exp %158 : vector<8x128xf32>
    %cst_40 = arith.constant 1.000000e+00 : f32
    %160 = vector.broadcast %cst_40 : f32 to vector<8x128xf32>
    %161 = arith.addf %160, %159 : vector<8x128xf32>
    %162 = arith.divf %160, %161 : vector<8x128xf32>
    %163 = vector.extract_strided_slice %156 {offsets = [0, 128], sizes = [8, 128], strides = [1, 1]} : vector<8x512xf32> to vector<8x128xf32>
    %164 = arith.negf %163 : vector<8x128xf32>
    %165 = math.exp %164 : vector<8x128xf32>
    %cst_41 = arith.constant 1.000000e+00 : f32
    %166 = vector.broadcast %cst_41 : f32 to vector<8x128xf32>
    %167 = arith.addf %166, %165 : vector<8x128xf32>
    %168 = arith.divf %166, %167 : vector<8x128xf32>
    %169 = vector.extract_strided_slice %156 {offsets = [0, 256], sizes = [8, 128], strides = [1, 1]} : vector<8x512xf32> to vector<8x128xf32>
    %170 = math.tanh %169 : vector<8x128xf32>
    %171 = vector.extract_strided_slice %156 {offsets = [0, 384], sizes = [8, 128], strides = [1, 1]} : vector<8x512xf32> to vector<8x128xf32>
    %172 = arith.negf %171 : vector<8x128xf32>
    %173 = math.exp %172 : vector<8x128xf32>
    %cst_42 = arith.constant 1.000000e+00 : f32
    %174 = vector.broadcast %cst_42 : f32 to vector<8x128xf32>
    %175 = arith.addf %174, %173 : vector<8x128xf32>
    %176 = arith.divf %174, %175 : vector<8x128xf32>
    %177 = arith.mulf %168, %150 : vector<8x128xf32>
    %178 = arith.mulf %162, %170 : vector<8x128xf32>
    %179 = arith.addf %177, %178 : vector<8x128xf32>
    %180 = math.tanh %179 : vector<8x128xf32>
    %181 = arith.mulf %176, %180 : vector<8x128xf32>
    %182 = vector.extract_strided_slice %5 {offsets = [48, 0], sizes = [8, 512], strides = [1, 1]} : vector<64x512xf32> to vector<8x512xf32>
    %c0_43 = arith.constant 0 : index
    %c0_44 = arith.constant 0 : index
    %183 = vector.load %arg2[%c0_43, %c0_44] : memref<128x512xf32, #tpu.memory_space<vmem>>, vector<128x512xf32>
    %cst_45 = arith.constant dense<0.000000e+00> : vector<8x512xf32>
    %184 = tpu.matmul %181, %183, %cst_45 {dimension_numbers = #tpu.dot_dimension_numbers<[1], [0], [0], [1], [0, 0, 1, 1], [], []>} : vector<8x128xf32>, vector<128x512xf32>, vector<8x512xf32> -> vector<8x512xf32>
    %185 = arith.addf %182, %184 : vector<8x512xf32>
    %186 = vector.extract_strided_slice %185 {offsets = [0, 0], sizes = [8, 128], strides = [1, 1]} : vector<8x512xf32> to vector<8x128xf32>
    %187 = arith.negf %186 : vector<8x128xf32>
    %188 = math.exp %187 : vector<8x128xf32>
    %cst_46 = arith.constant 1.000000e+00 : f32
    %189 = vector.broadcast %cst_46 : f32 to vector<8x128xf32>
    %190 = arith.addf %189, %188 : vector<8x128xf32>
    %191 = arith.divf %189, %190 : vector<8x128xf32>
    %192 = vector.extract_strided_slice %185 {offsets = [0, 128], sizes = [8, 128], strides = [1, 1]} : vector<8x512xf32> to vector<8x128xf32>
    %193 = arith.negf %192 : vector<8x128xf32>
    %194 = math.exp %193 : vector<8x128xf32>
    %cst_47 = arith.constant 1.000000e+00 : f32
    %195 = vector.broadcast %cst_47 : f32 to vector<8x128xf32>
    %196 = arith.addf %195, %194 : vector<8x128xf32>
    %197 = arith.divf %195, %196 : vector<8x128xf32>
    %198 = vector.extract_strided_slice %185 {offsets = [0, 256], sizes = [8, 128], strides = [1, 1]} : vector<8x512xf32> to vector<8x128xf32>
    %199 = math.tanh %198 : vector<8x128xf32>
    %200 = vector.extract_strided_slice %185 {offsets = [0, 384], sizes = [8, 128], strides = [1, 1]} : vector<8x512xf32> to vector<8x128xf32>
    %201 = arith.negf %200 : vector<8x128xf32>
    %202 = math.exp %201 : vector<8x128xf32>
    %cst_48 = arith.constant 1.000000e+00 : f32
    %203 = vector.broadcast %cst_48 : f32 to vector<8x128xf32>
    %204 = arith.addf %203, %202 : vector<8x128xf32>
    %205 = arith.divf %203, %204 : vector<8x128xf32>
    %206 = arith.mulf %197, %179 : vector<8x128xf32>
    %207 = arith.mulf %191, %199 : vector<8x128xf32>
    %208 = arith.addf %206, %207 : vector<8x128xf32>
    %209 = math.tanh %208 : vector<8x128xf32>
    %210 = arith.mulf %205, %209 : vector<8x128xf32>
    %211 = vector.extract_strided_slice %5 {offsets = [56, 0], sizes = [8, 512], strides = [1, 1]} : vector<64x512xf32> to vector<8x512xf32>
    %c0_49 = arith.constant 0 : index
    %c0_50 = arith.constant 0 : index
    %212 = vector.load %arg2[%c0_49, %c0_50] : memref<128x512xf32, #tpu.memory_space<vmem>>, vector<128x512xf32>
    %cst_51 = arith.constant dense<0.000000e+00> : vector<8x512xf32>
    %213 = tpu.matmul %210, %212, %cst_51 {dimension_numbers = #tpu.dot_dimension_numbers<[1], [0], [0], [1], [0, 0, 1, 1], [], []>} : vector<8x128xf32>, vector<128x512xf32>, vector<8x512xf32> -> vector<8x512xf32>
    %214 = arith.addf %211, %213 : vector<8x512xf32>
    %215 = vector.extract_strided_slice %214 {offsets = [0, 0], sizes = [8, 128], strides = [1, 1]} : vector<8x512xf32> to vector<8x128xf32>
    %216 = arith.negf %215 : vector<8x128xf32>
    %217 = math.exp %216 : vector<8x128xf32>
    %cst_52 = arith.constant 1.000000e+00 : f32
    %218 = vector.broadcast %cst_52 : f32 to vector<8x128xf32>
    %219 = arith.addf %218, %217 : vector<8x128xf32>
    %220 = arith.divf %218, %219 : vector<8x128xf32>
    %221 = vector.extract_strided_slice %214 {offsets = [0, 128], sizes = [8, 128], strides = [1, 1]} : vector<8x512xf32> to vector<8x128xf32>
    %222 = arith.negf %221 : vector<8x128xf32>
    %223 = math.exp %222 : vector<8x128xf32>
    %cst_53 = arith.constant 1.000000e+00 : f32
    %224 = vector.broadcast %cst_53 : f32 to vector<8x128xf32>
    %225 = arith.addf %224, %223 : vector<8x128xf32>
    %226 = arith.divf %224, %225 : vector<8x128xf32>
    %227 = vector.extract_strided_slice %214 {offsets = [0, 256], sizes = [8, 128], strides = [1, 1]} : vector<8x512xf32> to vector<8x128xf32>
    %228 = math.tanh %227 : vector<8x128xf32>
    %229 = vector.extract_strided_slice %214 {offsets = [0, 384], sizes = [8, 128], strides = [1, 1]} : vector<8x512xf32> to vector<8x128xf32>
    %230 = arith.negf %229 : vector<8x128xf32>
    %231 = math.exp %230 : vector<8x128xf32>
    %cst_54 = arith.constant 1.000000e+00 : f32
    %232 = vector.broadcast %cst_54 : f32 to vector<8x128xf32>
    %233 = arith.addf %232, %231 : vector<8x128xf32>
    %234 = arith.divf %232, %233 : vector<8x128xf32>
    %235 = arith.mulf %226, %208 : vector<8x128xf32>
    %236 = arith.mulf %220, %228 : vector<8x128xf32>
    %237 = arith.addf %235, %236 : vector<8x128xf32>
    %238 = math.tanh %237 : vector<8x128xf32>
    %239 = arith.mulf %234, %238 : vector<8x128xf32>
    %c0_55 = arith.constant 0 : index
    %c0_56 = arith.constant 0 : index
    %240 = vector.load %arg4[%c0_55, %c0_56] : memref<128x128xf32, #tpu.memory_space<vmem>>, vector<128x128xf32>
    %cst_57 = arith.constant dense<0.000000e+00> : vector<8x128xf32>
    %241 = tpu.matmul %239, %240, %cst_57 {dimension_numbers = #tpu.dot_dimension_numbers<[1], [0], [0], [1], [0, 0, 1, 1], [], []>} : vector<8x128xf32>, vector<128x128xf32>, vector<8x128xf32> -> vector<8x128xf32>
    %c0_58 = arith.constant 0 : index
    %c0_59 = arith.constant 0 : index
    %242 = vector.load %arg5[%c0_58, %c0_59] : memref<1x128xf32, #tpu.memory_space<vmem>>, vector<1x128xf32>
    %243 = vector.broadcast %242 : vector<1x128xf32> to vector<8x128xf32>
    %244 = arith.addf %241, %243 : vector<8x128xf32>
    %c0_60 = arith.constant 0 : index
    %c0_61 = arith.constant 0 : index
    %245 = vector.load %arg6[%c0_60, %c0_61] : memref<8x128xf32, #tpu.memory_space<vmem>>, vector<8x128xf32>
    tpu.vector_store %arg6[%c0_60, %c0_61], %244 {strides = array<i32>} : memref<8x128xf32, #tpu.memory_space<vmem>>, vector<8x128xf32>,
    return
  }
}

</mosaic_0001>

<bundles_post_ra>
// kernel: tpu_custom_call.1
= control target key start
LH: loop header
LB: loop body
LE: loop exit
PB: predicated region body
PF: predicated region fallthrough
CT: control target
= control target key end

     0   :  { %11 = vsyncpa [#allocation3], 0  ;;  %s3336_s0 = inlined_call_operand.vmem [shape: f32[64,8], index: 0, kind: input, shape index: {}]   ;;  %s3337_s1 = inlined_call_operand.vmem [shape: f32[8,512], index: 1, kind: input, shape index: {}]   ;;  %s3338_s2 = inlined_call_operand.hbm [shape: f32[128,512], index: 2, kind: input, shape index: {}]   ;;  %s3339_s3 = inlined_call_operand.vmem [shape: f32[1,512], index: 3, kind: input, shape index: {}]   ;;  %s3340_s4 = inlined_call_operand.hbm [shape: f32[128,128], index: 4, kind: input, shape index: {}]   ;;  %s3341_s5 = inlined_call_operand.vmem [shape: f32[1,128], index: 5, kind: input, shape index: {}]   ;;  %s3342_s6 = inlined_call_operand.hbm [shape: f32[8,128], index: 6, kind: output, shape index: {}]  }
   0x1   :  { %12 = vsyncpa [#allocation6], 0 }
   0x2   :  { %13 = vsyncpa [#allocation4], 0  ;;  %s2774_s21 = smov [#allocation2]   ;;  %s2702_s25 = scalar_lea.hbm %s3338_s2, 8192 }
   0x3   :  { %s23_s22 = sshll.u32 %s2774_s21, 4  ;;  %p2703_p0 = scmp.ne.s32.totalorder %s3338_s2, %s2702_s25  ;;  %s24_s22 = int_to_ptr.vmem [resolvable:$true] %s23_s22 }
   0x4   :  { %p2706_p1 = scmp.lt.u32.totalorder %s2702_s25, %s3338_s2 }
   0x6   :  { %p2708_p2 = pnand %p2706_p1, %p2703_p0 }
   0x8   :  { %2711 = shalt.err (!%p2708_p2)
}
   0x9   :  { %s2712_s30 = scalar_lea.vmem %s24_s22, 8192  ;;  %p2717_p4 = scmp.lt.s32.totalorder %s24_s22, %s24_s22 }
   0xa   :  { %p2713_p3 = scmp.ne.s32.totalorder %s24_s22, %s2712_s30  ;;  %p2718_p5 = scmp.lt.s32.totalorder %s2712_s30, %s2712_s30 }
   0xc   :  { %p2719_p6 = por %p2718_p5, %p2717_p4 }
   0xe   :  { %p2720_p7 = pnand %p2719_p6, %p2713_p3 }
  0x10   :  { %2723 = shalt.err (!%p2720_p7)
}
  0x11   :  { %s2775_s7 = smov 512   ;;  %s2776_s8 = smov 32  }
  0x12   :  { %29 = dma.hbm_to_vmem [thread:$0]  %s3338_s2, 8192, %s24_s22, [#allocation3], %s2775_s7, %s2775_s7, %s2776_s8  }
  0x13   :  { %s2777_s11 = smov [#allocation5]   ;;  %s2724_s15 = scalar_lea.hbm %s3340_s4, 2048 }
  0x14   :  { %s37_s12 = sshll.u32 %s2777_s11, 4  ;;  %p2725_p8 = scmp.ne.s32.totalorder %s3340_s4, %s2724_s15  ;;  %s38_s12 = int_to_ptr.vmem [resolvable:$true] %s37_s12 }
  0x15   :  { %p2728_p9 = scmp.lt.u32.totalorder %s2724_s15, %s3340_s4 }
  0x17   :  { %p2730_p10 = pnand %p2728_p9, %p2725_p8 }
  0x19   :  { %2733 = shalt.err (!%p2730_p10)
}
  0x1a   :  { %s2734_s20 = scalar_lea.vmem %s38_s12, 2048  ;;  %p2739_p12 = scmp.lt.s32.totalorder %s38_s12, %s38_s12 }
  0x1b   :  { %p2735_p11 = scmp.ne.s32.totalorder %s38_s12, %s2734_s20  ;;  %p2740_p13 = scmp.lt.s32.totalorder %s2734_s20, %s2734_s20 }
  0x1d   :  { %p2741_p0 = por %p2740_p13, %p2739_p12 }
  0x1f   :  { %p2742_p1 = pnand %p2741_p0, %p2735_p11 }
  0x21   :  { %2745 = shalt.err (!%p2742_p1)
}
  0x22   :  { %s2778_s2 = smov 128   ;;  %s2779_s21 = smov 8  }
  0x23   :  { %43 = dma.hbm_to_vmem [thread:$0]  %s3340_s4, 2048, %s38_s12, [#allocation6], %s2778_s2, %s2778_s2, %s2779_s21  }
  0x24   :  { %2768 = dma.done.wait [#allocation3], 8192  }
  0x25   :  { %2769 = vsyncadd [#allocation3], 4294959104 }
  0x26   :  { %2770 = dma.done.wait [#allocation6], 2048  }
  0x27   :  { %2771 = vsyncadd [#allocation6], 4294965248  ;;  %v2780_v0 = vmov 0.0   ;;  %v61_v1 = vld [vmem:[%s3337_s1 + $0x8] sm:$0xff]  ;;  %v63_v2 = vld [vmem:[%s3337_s1 + $0x18] sm:$0xff]  ;;  %vm86_vm0 = vcmask 64512  }
  0x28   :  { %175 = vmatprep.mubr.f32.mxu0 %v2780_v0  ;;  %288 = vmatprep.mubr.f32.mxu1 %v2780_v0  ;;  %v60_v3 = vld [vmem:[%s3337_s1] sm:$0xff]  ;;  %v62_v4 = vld [vmem:[%s3337_s1 + $0x10] sm:$0xff]  ;;  %v338_v6 = vld [vmem:[#allocation2 + $0x8] sm:$0xff]  ;;  %vm2782_vm1 = vmmov 0   ;;  %s2783_s23 = smov [#allocation7]  }
  0x29   :  { %111 = vmatprep.subr.mxu0 %v61_v1  ;;  %224 = vmatprep.subr.mxu1 %v63_v2  ;;  %v52_v5 = vld [vmem:[%s3336_s0] sm:$0xff]  ;;  %v342_v7 = vld [vmem:[#allocation2 + $0x28] sm:$0xff]  ;;  %v340_v8 = vld [vmem:[#allocation2 + $0x18] sm:$0xff]  ;;  %s1861_s24 = sshll.u32 %s2783_s23, 4  ;;  %s1862_s24 = int_to_ptr.vmem [resolvable:$true] %s1861_s24 }
  0x2a   :  { %112 = vmatpush1.msra.mxu0 %v60_v3  ;;  %225 = vmatpush1.msra.mxu1 %v62_v4  ;;  %v344_v9 = vld [vmem:[#allocation2 + $0x38] sm:$0xff]  ;;  %v2862_v10 = vpack.c.bf16 %v342_v7, %v338_v6  ;;  %v337_v12 = vld [vmem:[#allocation2] sm:$0xff]  ;;  %v339_v14 = vld [vmem:[#allocation2 + $0x10] sm:$0xff]  ;;  %s2746_s25 = scalar_lea.vmem %s1862_s24, 128  ;;  %p2751_p3 = scmp.lt.s32.totalorder %s1862_s24, %s1862_s24 }
  0x2b   :  { %1871 = vmatmul.mubr.msk.f32.vlgmr.msra.gmra.mrb[0].mxu0 %vm86_vm0, %v52_v5  ;;  %1879 = vmatmul.mubr.msk.f32.vlgmr.msra.gmra.mrb[0].mxu1 %vm86_vm0, %v52_v5  ;;  %v2864_v11 = vpack.c.bf16 %v344_v9, %v340_v8  ;;  %v341_v13 = vld [vmem:[#allocation2 + $0x20] sm:$0xff]  ;;  %v343_v16 = vld [vmem:[#allocation2 + $0x30] sm:$0xff]  ;;  %v53_v17 = vld [vmem:[%s3336_s0 + $0x8] sm:$0xff]  ;;  %p2747_p2 = scmp.ne.s32.totalorder %s1862_s24, %s2746_s25  ;;  %p2752_p4 = scmp.lt.s32.totalorder %s2746_s25, %s2746_s25 }
  0x2c   :  { %v2866_v15 = vpack.c.bf16 %v341_v13, %v337_v12  ;;  %181 = vmatprep.mubr.f32.mxu0 %v2780_v0  ;;  %294 = vmatprep.mubr.f32.mxu1 %v2780_v0  ;;  %v346_v18 = vld [vmem:[#allocation2 + $0x48] sm:$0xff]  ;;  %v2875_v19 = vpack.c.bf16 %v343_v16, %v339_v14  ;;  %v348_v21 = vld [vmem:[#allocation2 + $0x58] sm:$0xff]  ;;  %v345_v25 = vld [vmem:[#allocation2 + $0x40] sm:$0xff] }
  0x2d   :  { %1965 = vmatprep.subr.bf16.mxu0 %v2862_v10  ;;  %1997 = vmatprep.subr.bf16.mxu1 %v2864_v11  ;;  %v350_v20 = vld [vmem:[#allocation2 + $0x68] sm:$0xff]  ;;  %v352_v22 = vld [vmem:[#allocation2 + $0x78] sm:$0xff]  ;;  %v349_v26 = vld [vmem:[#allocation2 + $0x60] sm:$0xff]  ;;  %p2753_p5 = por %p2752_p4, %p2751_p3 }
  0x2e   :  { %1967 = vmatpush1.bf16.msra.mxu0 %v2866_v15  ;;  %v2878_v23 = vpack.c.bf16 %v350_v20, %v346_v18  ;;  %v2880_v24 = vpack.c.bf16 %v352_v22, %v348_v21  ;;  %v347_v27 = vld [vmem:[#allocation2 + $0x50] sm:$0xff]  ;;  %1999 = vmatpush1.bf16.msra.mxu1 %v2875_v19  ;;  %v2884_v28 = vpack.c.bf16 %v349_v26, %v345_v25  ;;  %v354_v31 = vld [vmem:[#allocation2 + $0x88] sm:$0xff]  ;;  %v356_v34 = vld [vmem:[#allocation2 + $0x98] sm:$0xff] }
  0x2f   :  { %1872 = vmatmul.mubr.msk.f32.gmra.mrb[2].mxu0 %vm86_vm0, %v53_v17  ;;  %v351_v29 = vld [vmem:[#allocation2 + $0x70] sm:$0xff]  ;;  %1880 = vmatmul.mubr.msk.f32.gmra.mrb[2].mxu1 %vm86_vm0, %v53_v17  ;;  %v358_v33 = vld [vmem:[#allocation2 + $0xa8] sm:$0xff]  ;;  %v360_v35 = vld [vmem:[#allocation2 + $0xb8] sm:$0xff]  ;;  %p2754_p6 = pnand %p2753_p5, %p2747_p2 }
  0x30   :  { %v54_v30 = vld [vmem:[%s3336_s0 + $0x10] sm:$0xff]  ;;  %1969 = vmatprep.subr.bf16.mxu0 %v2878_v23  ;;  %v2891_v32 = vpack.c.bf16 %v351_v29, %v347_v27  ;;  %2001 = vmatprep.subr.bf16.mxu1 %v2880_v24  ;;  %v2895_v36 = vpack.c.bf16 %v358_v33, %v354_v31  ;;  %v2897_v37 = vpack.c.bf16 %v360_v35, %v356_v34  ;;  %v353_v38 = vld [vmem:[#allocation2 + $0x80] sm:$0xff]  ;;  %v55_v43 = vld [vmem:[%s3336_s0 + $0x18] sm:$0xff] }
  0x31   :  { %187 = vmatprep.mubr.f32.mxu0 %v2780_v0  ;;  %v357_v39 = vld [vmem:[#allocation2 + $0xa0] sm:$0xff]  ;;  %v355_v40 = vld [vmem:[#allocation2 + $0x90] sm:$0xff]  ;;  %300 = vmatprep.mubr.f32.mxu1 %v2780_v0  ;;  %v362_v44 = vld [vmem:[#allocation2 + $0xc8] sm:$0xff] }
  0x32   :  { %1971 = vmatpush1.bf16.msra.mxu0 %v2884_v28  ;;  %v2901_v41 = vpack.c.bf16 %v357_v39, %v353_v38  ;;  %v359_v42 = vld [vmem:[#allocation2 + $0xb0] sm:$0xff]  ;;  %2003 = vmatpush1.bf16.msra.mxu1 %v2891_v32  ;;  %v366_v46 = vld [vmem:[#allocation2 + $0xe8] sm:$0xff]  ;;  %v364_v47 = vld [vmem:[#allocation2 + $0xd8] sm:$0xff] }
  0x33   :  { %1873 = vmatmul.mubr.msk.f32.gmra.mrb[4].mxu0 %vm86_vm0, %v54_v30  ;;  %v2908_v45 = vpack.c.bf16 %v359_v42, %v355_v40  ;;  %v368_v48 = vld [vmem:[#allocation2 + $0xf8] sm:$0xff]  ;;  %1881 = vmatmul.mubr.msk.f32.gmra.mrb[4].mxu1 %vm86_vm0, %v54_v30  ;;  %v2912_v49 = vpack.c.bf16 %v366_v46, %v362_v44  ;;  %v361_v50 = vld [vmem:[#allocation2 + $0xc0] sm:$0xff]  ;;  %v363_v52 = vld [vmem:[#allocation2 + $0xd0] sm:$0xff] }
  0x34   :  { %1973 = vmatprep.subr.bf16.mxu0 %v2895_v36  ;;  %v365_v51 = vld [vmem:[#allocation2 + $0xe0] sm:$0xff]  ;;  %2005 = vmatprep.subr.bf16.mxu1 %v2897_v37  ;;  %v2916_v53 = vpack.c.bf16 %v368_v48, %v364_v47  ;;  %v367_v54 = vld [vmem:[#allocation2 + $0xf0] sm:$0xff]  ;;  %v370_v55 = vld [vmem:[#allocation2 + $0x108] sm:$0xff] }
  0x35   :  { %193 = vmatprep.mubr.f32.mxu0 %v2780_v0  ;;  %306 = vmatprep.mubr.f32.mxu1 %v2780_v0  ;;  %v2920_v56 = vpack.c.bf16 %v365_v51, %v361_v50  ;;  %v374_v57 = vld [vmem:[#allocation2 + $0x128] sm:$0xff]  ;;  %v372_v58 = vld [vmem:[#allocation2 + $0x118] sm:$0xff]  ;;  %v2924_v60 = vpack.c.bf16 %v367_v54, %v363_v52  ;;  %v369_v61 = vld [vmem:[#allocation2 + $0x100] sm:$0xff] }
  0x36   :  { %1975 = vmatpush1.bf16.msra.mxu0 %v2901_v41  ;;  %v376_v59 = vld [vmem:[#allocation2 + $0x138] sm:$0xff]  ;;  %2007 = vmatpush1.bf16.msra.mxu1 %v2908_v45  ;;  %v373_v62 = vld [vmem:[#allocation2 + $0x120] sm:$0xff]  ;;  %v2931_v1 = vpack.c.bf16 %v374_v57, %v370_v55  ;;  %v371_v2 = vld [vmem:[#allocation2 + $0x110] sm:$0xff] }
  0x37   :  { %1874 = vmatmul.mubr.msk.f32.gmra.mrb[6].mxu0 %vm86_vm0, %v55_v43  ;;  %1882 = vmatmul.mubr.msk.f32.gmra.mrb[6].mxu1 %vm86_vm0, %v55_v43  ;;  %v56_v63 = vld [vmem:[%s3336_s0 + $0x20] sm:$0xff]  ;;  %v375_v3 = vld [vmem:[#allocation2 + $0x130] sm:$0xff]  ;;  %v2935_v4 = vpack.c.bf16 %v376_v59, %v372_v58  ;;  %v378_v5 = vld [vmem:[#allocation2 + $0x148] sm:$0xff]  ;;  %v2939_v7 = vpack.c.bf16 %v373_v62, %v369_v61  ;;  %v66_v62 = vlaneseq }
  0x38   :  { %1977 = vmatprep.subr.bf16.mxu0 %v2912_v49  ;;  %2009 = vmatprep.subr.bf16.mxu1 %v2916_v53  ;;  %v382_v6 = vld [vmem:[#allocation2 + $0x168] sm:$0xff]  ;;  %v380_v8 = vld [vmem:[#allocation2 + $0x158] sm:$0xff]  ;;  %v2943_v12 = vpack.c.bf16 %v375_v3, %v371_v2  ;;  %v377_v13 = vld [vmem:[#allocation2 + $0x140] sm:$0xff] }
  0x39   :  { %199 = vmatprep.mubr.f32.mxu0 %v2780_v0  ;;  %312 = vmatprep.mubr.f32.mxu1 %v2780_v0  ;;  %v384_v9 = vld [vmem:[#allocation2 + $0x178] sm:$0xff]  ;;  %v381_v14 = vld [vmem:[#allocation2 + $0x160] sm:$0xff]  ;;  %v57_v16 = vld [vmem:[%s3336_s0 + $0x28] sm:$0xff]  ;;  %v2950_v17 = vpack.c.bf16 %v382_v6, %v378_v5 }
  0x3a   :  { %1979 = vmatpush1.bf16.msra.mxu0 %v2920_v56  ;;  %2011 = vmatpush1.bf16.msra.mxu1 %v2924_v60  ;;  %v379_v18 = vld [vmem:[#allocation2 + $0x150] sm:$0xff]  ;;  %v2954_v21 = vpack.c.bf16 %v384_v9, %v380_v8  ;;  %v386_v22 = vld [vmem:[#allocation2 + $0x188] sm:$0xff]  ;;  %v2958_v26 = vpack.c.bf16 %v381_v14, %v377_v13  ;;  %v388_v27 = vld [vmem:[#allocation2 + $0x198] sm:$0xff] }
  0x3b   :  { %1875 = vmatmul.mubr.msk.f32.gmra.mrb[8].mxu0 %vm86_vm0, %v56_v63  ;;  %1883 = vmatmul.mubr.msk.f32.gmra.mrb[8].mxu1 %vm86_vm0, %v56_v63  ;;  %v383_v20 = vld [vmem:[#allocation2 + $0x170] sm:$0xff]  ;;  %v390_v25 = vld [vmem:[#allocation2 + $0x1a8] sm:$0xff]  ;;  %v392_v29 = vld [vmem:[#allocation2 + $0x1b8] sm:$0xff]  ;;  %v67_v63 = vshrl.u32 %v66_v62, 7 }
  0x3c   :  { %1981 = vmatprep.subr.bf16.mxu0 %v2931_v1  ;;  %2013 = vmatprep.subr.bf16.mxu1 %v2935_v4  ;;  %v2962_v30 = vpack.c.bf16 %v383_v20, %v379_v18  ;;  %v385_v31 = vld [vmem:[#allocation2 + $0x180] sm:$0xff]  ;;  %v58_v34 = vld [vmem:[%s3336_s0 + $0x30] sm:$0xff]  ;;  %v2969_v35 = vpack.c.bf16 %v390_v25, %v386_v22  ;;  %v2973_v40 = vpack.c.bf16 %v392_v29, %v388_v27  ;;  %v394_v42 = vld [vmem:[#allocation2 + $0x1c8] sm:$0xff] }
  0x3d   :  { %205 = vmatprep.mubr.f32.mxu0 %v2780_v0  ;;  %318 = vmatprep.mubr.f32.mxu1 %v2780_v0  ;;  %v389_v33 = vld [vmem:[#allocation2 + $0x1a0] sm:$0xff]  ;;  %v387_v38 = vld [vmem:[#allocation2 + $0x190] sm:$0xff]  ;;  %v398_v43 = vld [vmem:[#allocation2 + $0x1e8] sm:$0xff]  ;;  %v68_v2 = vsub.s32 0, %v67_v63  ;;  %v72_v5 = vsub.s32 1, %v67_v63  ;;  %v80_v13 = vsub.s32 3, %v67_v63 }
  0x3e   :  { %1983 = vmatpush1.bf16.msra.mxu0 %v2939_v7  ;;  %2015 = vmatpush1.bf16.msra.mxu1 %v2943_v12  ;;  %v391_v39 = vld [vmem:[#allocation2 + $0x1b0] sm:$0xff]  ;;  %v2977_v44 = vpack.c.bf16 %v389_v33, %v385_v31  ;;  %v396_v46 = vld [vmem:[#allocation2 + $0x1d8] sm:$0xff]  ;;  %v393_v50 = vld [vmem:[#allocation2 + $0x1c0] sm:$0xff]  ;;  %v2988_v54 = vpack.c.bf16 %v398_v43, %v394_v42  ;;  %v76_v31 = vsub.s32 2, %v67_v63 }
  0x3f   :  { %1876 = vmatmul.mubr.msk.f32.gmra.mrb[10].mxu0 %vm86_vm0, %v57_v16  ;;  %1884 = vmatmul.mubr.msk.f32.gmra.mrb[10].mxu1 %vm86_vm0, %v57_v16  ;;  %v400_v47 = vld [vmem:[#allocation2 + $0x1f8] sm:$0xff]  ;;  %v2981_v48 = vpack.c.bf16 %v391_v39, %v387_v38  ;;  %v397_v51 = vld [vmem:[#allocation2 + $0x1e0] sm:$0xff]  ;;  %v395_v55 = vld [vmem:[#allocation2 + $0x1d0] sm:$0xff] }
  0x40   :  { %1985 = vmatprep.subr.bf16.mxu0 %v2950_v17  ;;  %2017 = vmatprep.subr.bf16.mxu1 %v2954_v21  ;;  %v59_v52 = vld [vmem:[%s3336_s0 + $0x38] sm:$0xff]  ;;  %v399_v57 = vld [vmem:[#allocation2 + $0x1f0] sm:$0xff]  ;;  %v2992_v58 = vpack.c.bf16 %v400_v47, %v396_v46  ;;  %v2996_v59 = vpack.c.bf16 %v397_v51, %v393_v50  ;;  %v64_v3 = vld [vmem:[%s3339_s3] sm:$0xf] }
  0x41   :  { %211 = vmatprep.mubr.f32.mxu0 %v2780_v0  ;;  %324 = vmatprep.mubr.f32.mxu1 %v2780_v0  ;;  %v3000_v61 = vpack.c.bf16 %v399_v57, %v395_v55  ;;  %v3050_v6 = vrot.slane %v64_v3, %v68_v2  ;;  %v3052_v8 = vrot.slane %v64_v3, %v72_v5 }
  0x42   :  { %1987 = vmatpush1.bf16.msra.mxu0 %v2958_v26  ;;  %2019 = vmatpush1.bf16.msra.mxu1 %v2962_v30  ;;  %v3056_v29 = vrot.slane %v64_v3, %v80_v13 }
  0x43   :  { %1877 = vmatmul.mubr.msk.f32.gmra.mrb[12].mxu0 %vm86_vm0, %v58_v34  ;;  %1885 = vmatmul.mubr.msk.f32.gmra.mrb[12].mxu1 %vm86_vm0, %v58_v34  ;;  %v3059_v34 = vrot.slane %v64_v3, %v76_v31 }
  0x44   :  { %1989 = vmatprep.subr.bf16.mxu0 %v2969_v35  ;;  %2021 = vmatprep.subr.bf16.mxu1 %v2973_v40 }
  0x45   :  { %217 = vmatprep.mubr.f32.mxu0 %v2780_v0  ;;  %330 = vmatprep.mubr.f32.mxu1 %v2780_v0 }
  0x46   :  { %1991 = vmatpush1.bf16.msra.mxu0 %v2977_v44  ;;  %2023 = vmatpush1.bf16.msra.mxu1 %v2981_v48 }
  0x47   :  { %1878 = vmatmul.mubr.msk.f32.gmra.mrb[14].mxu0 %vm86_vm0, %v59_v52  ;;  %1886 = vmatmul.mubr.msk.f32.gmra.mrb[14].mxu1 %vm86_vm0, %v59_v52 }
  0x48   :  { %1993 = vmatprep.subr.bf16.mxu0 %v2988_v54  ;;  %2025 = vmatprep.subr.bf16.mxu1 %v2992_v58 }
  0x49   :  { %465 = vmatprep.mubr.f32.mxu0 %v2780_v0  ;;  %536 = vmatprep.mubr.f32.mxu1 %v2780_v0 }
  0x4a   :  { %1995 = vmatpush1.bf16.msra.mxu0 %v2996_v59  ;;  %2027 = vmatpush1.bf16.msra.mxu1 %v3000_v61 }
  0x4b   :  { %2029 = vmatprep.subr.bf16.mxu0 %v2862_v10  ;;  %2061 = vmatprep.subr.bf16.mxu1 %v2864_v11 }
  0x4d   :  { %466 = vmatmul.mubr.f32.vlgmr.msra.gmra.mrb[0].mxu0 %v2780_v0  ;;  %537 = vmatmul.mubr.f32.vlgmr.msra.gmra.mrb[0].mxu1 %v2780_v0 }
  0x4e   :  { %2031 = vmatpush1.bf16.msra.mxu0 %v2866_v15  ;;  %2063 = vmatpush1.bf16.msra.mxu1 %v2875_v19 }
  0x4f   :  { %2033 = vmatprep.subr.bf16.mxu0 %v2878_v23  ;;  %2065 = vmatprep.subr.bf16.mxu1 %v2880_v24 }
  0x50   :  { %635 = vmatprep.mubr.f32.mxu0 %v2780_v0  ;;  %706 = vmatprep.mubr.f32.mxu1 %v2780_v0 }
  0x52   :  { %2035 = vmatpush1.bf16.msra.mxu0 %v2884_v28  ;;  %2067 = vmatpush1.bf16.msra.mxu1 %v2891_v32 }
  0x53   :  { %2037 = vmatprep.subr.bf16.mxu0 %v2895_v36  ;;  %2069 = vmatprep.subr.bf16.mxu1 %v2897_v37 }
  0x56   :  { %2039 = vmatpush1.bf16.msra.mxu0 %v2901_v41  ;;  %2071 = vmatpush1.bf16.msra.mxu1 %v2908_v45 }
  0x57   :  { %2041 = vmatprep.subr.bf16.mxu0 %v2912_v49  ;;  %2073 = vmatprep.subr.bf16.mxu1 %v2916_v53 }
  0x5a   :  { %2043 = vmatpush1.bf16.msra.mxu0 %v2920_v56  ;;  %2075 = vmatpush1.bf16.msra.mxu1 %v2924_v60 }
  0x5b   :  { %2045 = vmatprep.subr.bf16.mxu0 %v2931_v1  ;;  %2077 = vmatprep.subr.bf16.mxu1 %v2935_v4 }
  0x5e   :  { %2047 = vmatpush1.bf16.msra.mxu0 %v2939_v7  ;;  %2079 = vmatpush1.bf16.msra.mxu1 %v2943_v12 }
  0x5f   :  { %2049 = vmatprep.subr.bf16.mxu0 %v2950_v17  ;;  %2081 = vmatprep.subr.bf16.mxu1 %v2954_v21 }
  0x62   :  { %2051 = vmatpush1.bf16.msra.mxu0 %v2958_v26  ;;  %2083 = vmatpush1.bf16.msra.mxu1 %v2962_v30 }
  0x63   :  { %2053 = vmatprep.subr.bf16.mxu0 %v2969_v35  ;;  %2085 = vmatprep.subr.bf16.mxu1 %v2973_v40 }
  0x66   :  { %2055 = vmatpush1.bf16.msra.mxu0 %v2977_v44  ;;  %2087 = vmatpush1.bf16.msra.mxu1 %v2981_v48 }
  0x67   :  { %2057 = vmatprep.subr.bf16.mxu0 %v2988_v54  ;;  %2089 = vmatprep.subr.bf16.mxu1 %v2992_v58 }
  0x6a   :  { %2059 = vmatpush1.bf16.msra.mxu0 %v2996_v59  ;;  %2091 = vmatpush1.bf16.msra.mxu1 %v3000_v61 }
  0x6b   :  { %2093 = vmatprep.subr.bf16.mxu0 %v2862_v10  ;;  %2125 = vmatprep.subr.bf16.mxu1 %v2864_v11 }
 0x120   :  { %v467_v9 = vpop.f32.mrb[0].mxu0  ;;  %v538_v16 = vpop.f32.mrb[0].mxu1 }
 0x121   :  { %v2500_v14 = vadd.f32 %v467_v9, %v3050_v6  ;;  %v469_v18 = vpop.f32.mrb[1].mxu0  ;;  %v540_v22 = vpop.f32.mrb[1].mxu1  ;;  %v2516_v39 = vadd.f32 %v538_v16, %v3059_v34 }
 0x122   :  { %v2501_v20 = vadd.f32 %v469_v18, %v3052_v8  ;;  %v2517_v33 = vadd.f32 %v540_v22, %v3056_v29 }
 0x123   :  { %v1887_v25 = vmul.f32 -1.442695, %v2500_v14 }
 0x124   :  { %v1888_v27 = vmul.f32 -1.442695, %v2501_v20  ;;  %v1889_v38 = vmul.f32 -1.442695, %v2517_v33 }
 0x125   :  { %2574 = vpow2.f32 %v1887_v25 }
 0x126   :  { %2576 = vpow2.f32 %v1888_v27 }
 0x127   :  { %2578 = vpow2.f32 %v1889_v38 }
 0x128   :  { %2580 = vtanh.f32 %v2516_v39 }
 0x12f   :  { %v2575_v42 = vpop.eup %2574 }
 0x130   :  { %v2577_v43 = vpop.eup %2576  ;;  %v550_v46 = vadd.f32 1.0, %v2575_v42 }
 0x131   :  { %v556_v47 = vadd.f32 1.0, %v2577_v43  ;;  %v2579_v50 = vpop.eup %2578 }
 0x132   :  { %2582 = vrcp.f32 %v550_v46  ;;  %v2581_v51 = vpop.eup %2580  ;;  %v563_v62 = vadd.f32 1.0, %v2579_v50 }
 0x133   :  { %2584 = vrcp.f32 %v556_v47 }
 0x134   :  { %2586 = vrcp.f32 %v563_v62 }
 0x13c   :  { %v2583_v52 = vpop.eup %2582 }
 0x13d   :  { %v2585_v55 = vpop.eup %2584  ;;  %v567_v57 = vmul.f32 %v2583_v52, %v2581_v51 }
 0x13e   :  { %v566_v63 = vmul.f32 0.0, %v2585_v55  ;;  %v2587_v3 = vpop.eup %2586 }
 0x140   :  { %v3062_v2 = vadd.f32 %v567_v57, %v566_v63 }
 0x142   :  { %2588 = vtanh.f32 %v3062_v2 }
 0x14c   :  { %v2589_v5 = vpop.eup %2588 }
 0x14d   :  { %v570_v9 = vmul.f32 %v2589_v5, %v2587_v3 }
 0x14f   :  { %636 = vmatmul.mubr.f32.vlgmr.msra.gmra.mrb[2].mxu0 %v570_v9  ;;  %707 = vmatmul.mubr.f32.vlgmr.msra.gmra.mrb[2].mxu1 %v570_v9 }
 0x150   :  { %2095 = vmatpush1.bf16.msra.mxu0 %v2866_v15  ;;  %2127 = vmatpush1.bf16.msra.mxu1 %v2875_v19 }
 0x151   :  { %2097 = vmatprep.subr.bf16.mxu0 %v2878_v23  ;;  %2129 = vmatprep.subr.bf16.mxu1 %v2880_v24 }
 0x152   :  { %805 = vmatprep.mubr.f32.mxu0 %v2780_v0  ;;  %876 = vmatprep.mubr.f32.mxu1 %v2780_v0 }
 0x154   :  { %2099 = vmatpush1.bf16.msra.mxu0 %v2884_v28  ;;  %2131 = vmatpush1.bf16.msra.mxu1 %v2891_v32 }
 0x155   :  { %2101 = vmatprep.subr.bf16.mxu0 %v2895_v36  ;;  %2133 = vmatprep.subr.bf16.mxu1 %v2897_v37 }
 0x158   :  { %2103 = vmatpush1.bf16.msra.mxu0 %v2901_v41  ;;  %2135 = vmatpush1.bf16.msra.mxu1 %v2908_v45 }
 0x159   :  { %2105 = vmatprep.subr.bf16.mxu0 %v2912_v49  ;;  %2137 = vmatprep.subr.bf16.mxu1 %v2916_v53 }
 0x15c   :  { %2107 = vmatpush1.bf16.msra.mxu0 %v2920_v56  ;;  %2139 = vmatpush1.bf16.msra.mxu1 %v2924_v60 }
 0x15d   :  { %2109 = vmatprep.subr.bf16.mxu0 %v2931_v1  ;;  %2141 = vmatprep.subr.bf16.mxu1 %v2935_v4 }
 0x160   :  { %2111 = vmatpush1.bf16.msra.mxu0 %v2939_v7  ;;  %2143 = vmatpush1.bf16.msra.mxu1 %v2943_v12 }
 0x161   :  { %2113 = vmatprep.subr.bf16.mxu0 %v2950_v17  ;;  %2145 = vmatprep.subr.bf16.mxu1 %v2954_v21 }
 0x164   :  { %2115 = vmatpush1.bf16.msra.mxu0 %v2958_v26  ;;  %2147 = vmatpush1.bf16.msra.mxu1 %v2962_v30 }
 0x165   :  { %2117 = vmatprep.subr.bf16.mxu0 %v2969_v35  ;;  %2149 = vmatprep.subr.bf16.mxu1 %v2973_v40 }
 0x168   :  { %2119 = vmatpush1.bf16.msra.mxu0 %v2977_v44  ;;  %2151 = vmatpush1.bf16.msra.mxu1 %v2981_v48 }
 0x169   :  { %2121 = vmatprep.subr.bf16.mxu0 %v2988_v54  ;;  %2153 = vmatprep.subr.bf16.mxu1 %v2992_v58 }
 0x16c   :  { %2123 = vmatpush1.bf16.msra.mxu0 %v2996_v59  ;;  %2155 = vmatpush1.bf16.msra.mxu1 %v3000_v61 }
 0x16d   :  { %2157 = vmatprep.subr.bf16.mxu0 %v2862_v10  ;;  %2189 = vmatprep.subr.bf16.mxu1 %v2864_v11 }
 0x222   :  { %v637_v13 = vpop.f32.mrb[2].mxu0  ;;  %v708_v14 = vpop.f32.mrb[2].mxu1 }
 0x223   :  { %v2502_v16 = vadd.f32 %v637_v13, %v3050_v6  ;;  %v639_v18 = vpop.f32.mrb[3].mxu0  ;;  %v710_v20 = vpop.f32.mrb[3].mxu1  ;;  %v2518_v38 = vadd.f32 %v708_v14, %v3059_v34 }
 0x224   :  { %v2503_v22 = vadd.f32 %v639_v18, %v3052_v8  ;;  %v2519_v31 = vadd.f32 %v710_v20, %v3056_v29 }
 0x225   :  { %v1890_v25 = vmul.f32 -1.442695, %v2502_v16 }
 0x226   :  { %v1891_v27 = vmul.f32 -1.442695, %v2503_v22  ;;  %v1892_v33 = vmul.f32 -1.442695, %v2519_v31 }
 0x227   :  { %2590 = vpow2.f32 %v1890_v25 }
 0x228   :  { %2592 = vpow2.f32 %v1891_v27 }
 0x229   :  { %2594 = vpow2.f32 %v1892_v33 }
 0x22a   :  { %2596 = vtanh.f32 %v2518_v38 }
 0x231   :  { %v2591_v39 = vpop.eup %2590 }
 0x232   :  { %v2593_v42 = vpop.eup %2592  ;;  %v720_v43 = vadd.f32 1.0, %v2591_v39 }
 0x233   :  { %v726_v46 = vadd.f32 1.0, %v2593_v42  ;;  %v2595_v47 = vpop.eup %2594 }
 0x234   :  { %2598 = vrcp.f32 %v720_v43  ;;  %v2597_v50 = vpop.eup %2596  ;;  %v733_v57 = vadd.f32 1.0, %v2595_v47 }
 0x235   :  { %2600 = vrcp.f32 %v726_v46 }
 0x236   :  { %2602 = vrcp.f32 %v733_v57 }
 0x23e   :  { %v2599_v51 = vpop.eup %2598 }
 0x23f   :  { %v2601_v52 = vpop.eup %2600  ;;  %v737_v55 = vmul.f32 %v2599_v51, %v2597_v50 }
 0x240   :  { %v736_v62 = vmul.f32 %v2601_v52, %v3062_v2  ;;  %v2603_v3 = vpop.eup %2602 }
 0x242   :  { %v3104_v63 = vadd.f32 %v737_v55, %v736_v62 }
 0x244   :  { %2604 = vtanh.f32 %v3104_v63 }
 0x24e   :  { %v2605_v5 = vpop.eup %2604 }
 0x24f   :  { %v740_v9 = vmul.f32 %v2605_v5, %v2603_v3 }
 0x251   :  { %806 = vmatmul.mubr.f32.vlgmr.msra.gmra.mrb[4].mxu0 %v740_v9  ;;  %877 = vmatmul.mubr.f32.vlgmr.msra.gmra.mrb[4].mxu1 %v740_v9 }
 0x252   :  { %2159 = vmatpush1.bf16.msra.mxu0 %v2866_v15  ;;  %2191 = vmatpush1.bf16.msra.mxu1 %v2875_v19 }
 0x253   :  { %2161 = vmatprep.subr.bf16.mxu0 %v2878_v23  ;;  %2193 = vmatprep.subr.bf16.mxu1 %v2880_v24 }
 0x254   :  { %975 = vmatprep.mubr.f32.mxu0 %v2780_v0  ;;  %1046 = vmatprep.mubr.f32.mxu1 %v2780_v0 }
 0x256   :  { %2163 = vmatpush1.bf16.msra.mxu0 %v2884_v28  ;;  %2195 = vmatpush1.bf16.msra.mxu1 %v2891_v32 }
 0x257   :  { %2165 = vmatprep.subr.bf16.mxu0 %v2895_v36  ;;  %2197 = vmatprep.subr.bf16.mxu1 %v2897_v37 }
 0x25a   :  { %2167 = vmatpush1.bf16.msra.mxu0 %v2901_v41  ;;  %2199 = vmatpush1.bf16.msra.mxu1 %v2908_v45 }
 0x25b   :  { %2169 = vmatprep.subr.bf16.mxu0 %v2912_v49  ;;  %2201 = vmatprep.subr.bf16.mxu1 %v2916_v53 }
 0x25e   :  { %2171 = vmatpush1.bf16.msra.mxu0 %v2920_v56  ;;  %2203 = vmatpush1.bf16.msra.mxu1 %v2924_v60 }
 0x25f   :  { %2173 = vmatprep.subr.bf16.mxu0 %v2931_v1  ;;  %2205 = vmatprep.subr.bf16.mxu1 %v2935_v4 }
 0x262   :  { %2175 = vmatpush1.bf16.msra.mxu0 %v2939_v7  ;;  %2207 = vmatpush1.bf16.msra.mxu1 %v2943_v12 }
 0x263   :  { %2177 = vmatprep.subr.bf16.mxu0 %v2950_v17  ;;  %2209 = vmatprep.subr.bf16.mxu1 %v2954_v21 }
 0x266   :  { %2179 = vmatpush1.bf16.msra.mxu0 %v2958_v26  ;;  %2211 = vmatpush1.bf16.msra.mxu1 %v2962_v30 }
 0x267   :  { %2181 = vmatprep.subr.bf16.mxu0 %v2969_v35  ;;  %2213 = vmatprep.subr.bf16.mxu1 %v2973_v40 }
 0x26a   :  { %2183 = vmatpush1.bf16.msra.mxu0 %v2977_v44  ;;  %2215 = vmatpush1.bf16.msra.mxu1 %v2981_v48 }
 0x26b   :  { %2185 = vmatprep.subr.bf16.mxu0 %v2988_v54  ;;  %2217 = vmatprep.subr.bf16.mxu1 %v2992_v58 }
 0x26e   :  { %2187 = vmatpush1.bf16.msra.mxu0 %v2996_v59  ;;  %2219 = vmatpush1.bf16.msra.mxu1 %v3000_v61 }
 0x26f   :  { %2221 = vmatprep.subr.bf16.mxu0 %v2862_v10  ;;  %2253 = vmatprep.subr.bf16.mxu1 %v2864_v11 }
 0x324   :  { %v807_v2 = vpop.f32.mrb[4].mxu0  ;;  %v878_v13 = vpop.f32.mrb[4].mxu1 }
 0x325   :  { %v2504_v14 = vadd.f32 %v807_v2, %v3050_v6  ;;  %v809_v16 = vpop.f32.mrb[5].mxu0  ;;  %v880_v18 = vpop.f32.mrb[5].mxu1  ;;  %v2520_v33 = vadd.f32 %v878_v13, %v3059_v34 }
 0x326   :  { %v2505_v20 = vadd.f32 %v809_v16, %v3052_v8  ;;  %v2521_v27 = vadd.f32 %v880_v18, %v3056_v29 }
 0x327   :  { %v1893_v22 = vmul.f32 -1.442695, %v2504_v14 }
 0x328   :  { %v1894_v25 = vmul.f32 -1.442695, %v2505_v20  ;;  %v1895_v31 = vmul.f32 -1.442695, %v2521_v27 }
 0x329   :  { %2606 = vpow2.f32 %v1893_v22 }
 0x32a   :  { %2608 = vpow2.f32 %v1894_v25 }
 0x32b   :  { %2610 = vpow2.f32 %v1895_v31 }
 0x32c   :  { %2612 = vtanh.f32 %v2520_v33 }
 0x333   :  { %v2607_v38 = vpop.eup %2606 }
 0x334   :  { %v2609_v39 = vpop.eup %2608  ;;  %v890_v42 = vadd.f32 1.0, %v2607_v38 }
 0x335   :  { %v896_v43 = vadd.f32 1.0, %v2609_v39  ;;  %v2611_v46 = vpop.eup %2610 }
 0x336   :  { %2614 = vrcp.f32 %v890_v42  ;;  %v2613_v47 = vpop.eup %2612  ;;  %v903_v55 = vadd.f32 1.0, %v2611_v46 }
 0x337   :  { %2616 = vrcp.f32 %v896_v43 }
 0x338   :  { %2618 = vrcp.f32 %v903_v55 }
 0x340   :  { %v2615_v50 = vpop.eup %2614 }
 0x341   :  { %v2617_v51 = vpop.eup %2616  ;;  %v907_v52 = vmul.f32 %v2615_v50, %v2613_v47 }
 0x342   :  { %v906_v57 = vmul.f32 %v2617_v51, %v3104_v63  ;;  %v2619_v3 = vpop.eup %2618 }
 0x344   :  { %v3146_v62 = vadd.f32 %v907_v52, %v906_v57 }
 0x346   :  { %2620 = vtanh.f32 %v3146_v62 }
 0x350   :  { %v2621_v5 = vpop.eup %2620 }
 0x351   :  { %v910_v9 = vmul.f32 %v2621_v5, %v2619_v3 }
 0x353   :  { %976 = vmatmul.mubr.f32.vlgmr.msra.gmra.mrb[6].mxu0 %v910_v9  ;;  %1047 = vmatmul.mubr.f32.vlgmr.msra.gmra.mrb[6].mxu1 %v910_v9 }
 0x354   :  { %2223 = vmatpush1.bf16.msra.mxu0 %v2866_v15  ;;  %2255 = vmatpush1.bf16.msra.mxu1 %v2875_v19 }
 0x355   :  { %2225 = vmatprep.subr.bf16.mxu0 %v2878_v23  ;;  %2257 = vmatprep.subr.bf16.mxu1 %v2880_v24 }
 0x356   :  { %1145 = vmatprep.mubr.f32.mxu0 %v2780_v0  ;;  %1216 = vmatprep.mubr.f32.mxu1 %v2780_v0 }
 0x358   :  { %2227 = vmatpush1.bf16.msra.mxu0 %v2884_v28  ;;  %2259 = vmatpush1.bf16.msra.mxu1 %v2891_v32 }
 0x359   :  { %2229 = vmatprep.subr.bf16.mxu0 %v2895_v36  ;;  %2261 = vmatprep.subr.bf16.mxu1 %v2897_v37 }
 0x35c   :  { %2231 = vmatpush1.bf16.msra.mxu0 %v2901_v41  ;;  %2263 = vmatpush1.bf16.msra.mxu1 %v2908_v45 }
 0x35d   :  { %2233 = vmatprep.subr.bf16.mxu0 %v2912_v49  ;;  %2265 = vmatprep.subr.bf16.mxu1 %v2916_v53 }
 0x360   :  { %2235 = vmatpush1.bf16.msra.mxu0 %v2920_v56  ;;  %2267 = vmatpush1.bf16.msra.mxu1 %v2924_v60 }
 0x361   :  { %2237 = vmatprep.subr.bf16.mxu0 %v2931_v1  ;;  %2269 = vmatprep.subr.bf16.mxu1 %v2935_v4 }
 0x364   :  { %2239 = vmatpush1.bf16.msra.mxu0 %v2939_v7  ;;  %2271 = vmatpush1.bf16.msra.mxu1 %v2943_v12 }
 0x365   :  { %2241 = vmatprep.subr.bf16.mxu0 %v2950_v17  ;;  %2273 = vmatprep.subr.bf16.mxu1 %v2954_v21 }
 0x368   :  { %2243 = vmatpush1.bf16.msra.mxu0 %v2958_v26  ;;  %2275 = vmatpush1.bf16.msra.mxu1 %v2962_v30 }
 0x369   :  { %2245 = vmatprep.subr.bf16.mxu0 %v2969_v35  ;;  %2277 = vmatprep.subr.bf16.mxu1 %v2973_v40 }
 0x36c   :  { %2247 = vmatpush1.bf16.msra.mxu0 %v2977_v44  ;;  %2279 = vmatpush1.bf16.msra.mxu1 %v2981_v48 }
 0x36d   :  { %2249 = vmatprep.subr.bf16.mxu0 %v2988_v54  ;;  %2281 = vmatprep.subr.bf16.mxu1 %v2992_v58 }
 0x370   :  { %2251 = vmatpush1.bf16.msra.mxu0 %v2996_v59  ;;  %2283 = vmatpush1.bf16.msra.mxu1 %v3000_v61 }
 0x371   :  { %2285 = vmatprep.subr.bf16.mxu0 %v2862_v10  ;;  %2317 = vmatprep.subr.bf16.mxu1 %v2864_v11 }
 0x426   :  { %v977_v63 = vpop.f32.mrb[6].mxu0  ;;  %v1048_v2 = vpop.f32.mrb[6].mxu1 }
 0x427   :  { %v2506_v13 = vadd.f32 %v977_v63, %v3050_v6  ;;  %v979_v14 = vpop.f32.mrb[7].mxu0  ;;  %v1050_v16 = vpop.f32.mrb[7].mxu1  ;;  %v2522_v31 = vadd.f32 %v1048_v2, %v3059_v34 }
 0x428   :  { %v2507_v18 = vadd.f32 %v979_v14, %v3052_v8  ;;  %v2523_v25 = vadd.f32 %v1050_v16, %v3056_v29 }
 0x429   :  { %v1896_v20 = vmul.f32 -1.442695, %v2506_v13 }
 0x42a   :  { %v1897_v22 = vmul.f32 -1.442695, %v2507_v18  ;;  %v1898_v27 = vmul.f32 -1.442695, %v2523_v25 }
 0x42b   :  { %2622 = vpow2.f32 %v1896_v20 }
 0x42c   :  { %2624 = vpow2.f32 %v1897_v22 }
 0x42d   :  { %2626 = vpow2.f32 %v1898_v27 }
 0x42e   :  { %2628 = vtanh.f32 %v2522_v31 }
 0x435   :  { %v2623_v33 = vpop.eup %2622 }
 0x436   :  { %v2625_v38 = vpop.eup %2624  ;;  %v1060_v39 = vadd.f32 1.0, %v2623_v33 }
 0x437   :  { %v1066_v42 = vadd.f32 1.0, %v2625_v38  ;;  %v2627_v43 = vpop.eup %2626 }
 0x438   :  { %2630 = vrcp.f32 %v1060_v39  ;;  %v2629_v46 = vpop.eup %2628  ;;  %v1073_v52 = vadd.f32 1.0, %v2627_v43 }
 0x439   :  { %2632 = vrcp.f32 %v1066_v42 }
 0x43a   :  { %2634 = vrcp.f32 %v1073_v52 }
 0x442   :  { %v2631_v47 = vpop.eup %2630 }
 0x443   :  { %v2633_v50 = vpop.eup %2632  ;;  %v1077_v51 = vmul.f32 %v2631_v47, %v2629_v46 }
 0x444   :  { %v1076_v55 = vmul.f32 %v2633_v50, %v3146_v62  ;;  %v2635_v3 = vpop.eup %2634 }
 0x446   :  { %v3188_v57 = vadd.f32 %v1077_v51, %v1076_v55 }
 0x448   :  { %2636 = vtanh.f32 %v3188_v57 }
 0x452   :  { %v2637_v5 = vpop.eup %2636 }
 0x453   :  { %v1080_v9 = vmul.f32 %v2637_v5, %v2635_v3 }
 0x455   :  { %1146 = vmatmul.mubr.f32.vlgmr.msra.gmra.mrb[8].mxu0 %v1080_v9  ;;  %1217 = vmatmul.mubr.f32.vlgmr.msra.gmra.mrb[8].mxu1 %v1080_v9 }
 0x456   :  { %2287 = vmatpush1.bf16.msra.mxu0 %v2866_v15  ;;  %2319 = vmatpush1.bf16.msra.mxu1 %v2875_v19 }
 0x457   :  { %2289 = vmatprep.subr.bf16.mxu0 %v2878_v23  ;;  %2321 = vmatprep.subr.bf16.mxu1 %v2880_v24 }
 0x458   :  { %1315 = vmatprep.mubr.f32.mxu0 %v2780_v0  ;;  %1386 = vmatprep.mubr.f32.mxu1 %v2780_v0 }
 0x45a   :  { %2291 = vmatpush1.bf16.msra.mxu0 %v2884_v28  ;;  %2323 = vmatpush1.bf16.msra.mxu1 %v2891_v32 }
 0x45b   :  { %2293 = vmatprep.subr.bf16.mxu0 %v2895_v36  ;;  %2325 = vmatprep.subr.bf16.mxu1 %v2897_v37 }
 0x45e   :  { %2295 = vmatpush1.bf16.msra.mxu0 %v2901_v41  ;;  %2327 = vmatpush1.bf16.msra.mxu1 %v2908_v45 }
 0x45f   :  { %2297 = vmatprep.subr.bf16.mxu0 %v2912_v49  ;;  %2329 = vmatprep.subr.bf16.mxu1 %v2916_v53 }
 0x462   :  { %2299 = vmatpush1.bf16.msra.mxu0 %v2920_v56  ;;  %2331 = vmatpush1.bf16.msra.mxu1 %v2924_v60 }
 0x463   :  { %2301 = vmatprep.subr.bf16.mxu0 %v2931_v1  ;;  %2333 = vmatprep.subr.bf16.mxu1 %v2935_v4 }
 0x466   :  { %2303 = vmatpush1.bf16.msra.mxu0 %v2939_v7  ;;  %2335 = vmatpush1.bf16.msra.mxu1 %v2943_v12 }
 0x467   :  { %2305 = vmatprep.subr.bf16.mxu0 %v2950_v17  ;;  %2337 = vmatprep.subr.bf16.mxu1 %v2954_v21 }
 0x46a   :  { %2307 = vmatpush1.bf16.msra.mxu0 %v2958_v26  ;;  %2339 = vmatpush1.bf16.msra.mxu1 %v2962_v30 }
 0x46b   :  { %2309 = vmatprep.subr.bf16.mxu0 %v2969_v35  ;;  %2341 = vmatprep.subr.bf16.mxu1 %v2973_v40 }
 0x46e   :  { %2311 = vmatpush1.bf16.msra.mxu0 %v2977_v44  ;;  %2343 = vmatpush1.bf16.msra.mxu1 %v2981_v48 }
 0x46f   :  { %2313 = vmatprep.subr.bf16.mxu0 %v2988_v54  ;;  %2345 = vmatprep.subr.bf16.mxu1 %v2992_v58 }
 0x472   :  { %2315 = vmatpush1.bf16.msra.mxu0 %v2996_v59  ;;  %2347 = vmatpush1.bf16.msra.mxu1 %v3000_v61 }
 0x473   :  { %2349 = vmatprep.subr.bf16.mxu0 %v2862_v10  ;;  %2381 = vmatprep.subr.bf16.mxu1 %v2864_v11 }
 0x528   :  { %v1147_v62 = vpop.f32.mrb[8].mxu0  ;;  %v1218_v63 = vpop.f32.mrb[8].mxu1 }
 0x529   :  { %v2508_v2 = vadd.f32 %v1147_v62, %v3050_v6  ;;  %v1149_v13 = vpop.f32.mrb[9].mxu0  ;;  %v1220_v14 = vpop.f32.mrb[9].mxu1  ;;  %v2524_v27 = vadd.f32 %v1218_v63, %v3059_v34 }
 0x52a   :  { %v2509_v16 = vadd.f32 %v1149_v13, %v3052_v8  ;;  %v2525_v22 = vadd.f32 %v1220_v14, %v3056_v29 }
 0x52b   :  { %v1899_v18 = vmul.f32 -1.442695, %v2508_v2 }
 0x52c   :  { %v1900_v20 = vmul.f32 -1.442695, %v2509_v16  ;;  %v1901_v25 = vmul.f32 -1.442695, %v2525_v22 }
 0x52d   :  { %2638 = vpow2.f32 %v1899_v18 }
 0x52e   :  { %2640 = vpow2.f32 %v1900_v20 }
 0x52f   :  { %2642 = vpow2.f32 %v1901_v25 }
 0x530   :  { %2644 = vtanh.f32 %v2524_v27 }
 0x537   :  { %v2639_v31 = vpop.eup %2638 }
 0x538   :  { %v2641_v33 = vpop.eup %2640  ;;  %v1230_v38 = vadd.f32 1.0, %v2639_v31 }
 0x539   :  { %v1236_v39 = vadd.f32 1.0, %v2641_v33  ;;  %v2643_v42 = vpop.eup %2642 }
 0x53a   :  { %2646 = vrcp.f32 %v1230_v38  ;;  %v2645_v43 = vpop.eup %2644  ;;  %v1243_v51 = vadd.f32 1.0, %v2643_v42 }
 0x53b   :  { %2648 = vrcp.f32 %v1236_v39 }
 0x53c   :  { %2650 = vrcp.f32 %v1243_v51 }
 0x544   :  { %v2647_v46 = vpop.eup %2646 }
 0x545   :  { %v2649_v47 = vpop.eup %2648  ;;  %v1247_v50 = vmul.f32 %v2647_v46, %v2645_v43 }
 0x546   :  { %v1246_v52 = vmul.f32 %v2649_v47, %v3188_v57  ;;  %v2651_v3 = vpop.eup %2650 }
 0x548   :  { %v3230_v55 = vadd.f32 %v1247_v50, %v1246_v52 }
 0x54a   :  { %2652 = vtanh.f32 %v3230_v55 }
 0x554   :  { %v2653_v5 = vpop.eup %2652 }
 0x555   :  { %v1250_v9 = vmul.f32 %v2653_v5, %v2651_v3  ;;  %v1764_v5 = vld [vmem:[#allocation5 + $0x18] sm:$0xff] }
 0x557   :  { %1316 = vmatmul.mubr.f32.vlgmr.msra.gmra.mrb[10].mxu0 %v1250_v9  ;;  %1387 = vmatmul.mubr.f32.vlgmr.msra.gmra.mrb[10].mxu1 %v1250_v9 }
 0x558   :  { %2351 = vmatpush1.bf16.msra.mxu0 %v2866_v15  ;;  %2383 = vmatpush1.bf16.msra.mxu1 %v2875_v19 }
 0x559   :  { %2353 = vmatprep.subr.bf16.mxu0 %v2878_v23  ;;  %2385 = vmatprep.subr.bf16.mxu1 %v2880_v24 }
 0x55a   :  { %1485 = vmatprep.mubr.f32.mxu0 %v2780_v0  ;;  %1556 = vmatprep.mubr.f32.mxu1 %v2780_v0 }
 0x55c   :  { %2355 = vmatpush1.bf16.msra.mxu0 %v2884_v28  ;;  %2387 = vmatpush1.bf16.msra.mxu1 %v2891_v32 }
 0x55d   :  { %2357 = vmatprep.subr.bf16.mxu0 %v2895_v36  ;;  %2389 = vmatprep.subr.bf16.mxu1 %v2897_v37 }
 0x560   :  { %2359 = vmatpush1.bf16.msra.mxu0 %v2901_v41  ;;  %2391 = vmatpush1.bf16.msra.mxu1 %v2908_v45 }
 0x561   :  { %2361 = vmatprep.subr.bf16.mxu0 %v2912_v49  ;;  %2393 = vmatprep.subr.bf16.mxu1 %v2916_v53 }
 0x564   :  { %2363 = vmatpush1.bf16.msra.mxu0 %v2920_v56  ;;  %2395 = vmatpush1.bf16.msra.mxu1 %v2924_v60 }
 0x565   :  { %2365 = vmatprep.subr.bf16.mxu0 %v2931_v1  ;;  %2397 = vmatprep.subr.bf16.mxu1 %v2935_v4 }
 0x568   :  { %2367 = vmatpush1.bf16.msra.mxu0 %v2939_v7  ;;  %2399 = vmatpush1.bf16.msra.mxu1 %v2943_v12 }
 0x569   :  { %2369 = vmatprep.subr.bf16.mxu0 %v2950_v17  ;;  %2401 = vmatprep.subr.bf16.mxu1 %v2954_v21 }
 0x56c   :  { %2371 = vmatpush1.bf16.msra.mxu0 %v2958_v26  ;;  %2403 = vmatpush1.bf16.msra.mxu1 %v2962_v30 }
 0x56d   :  { %2373 = vmatprep.subr.bf16.mxu0 %v2969_v35  ;;  %2405 = vmatprep.subr.bf16.mxu1 %v2973_v40 }
 0x570   :  { %2375 = vmatpush1.bf16.msra.mxu0 %v2977_v44  ;;  %2407 = vmatpush1.bf16.msra.mxu1 %v2981_v48 }
 0x571   :  { %2377 = vmatprep.subr.bf16.mxu0 %v2988_v54  ;;  %2409 = vmatprep.subr.bf16.mxu1 %v2992_v58 }
 0x574   :  { %2379 = vmatpush1.bf16.msra.mxu0 %v2996_v59  ;;  %2411 = vmatpush1.bf16.msra.mxu1 %v3000_v61 }
 0x575   :  { %2413 = vmatprep.subr.bf16.mxu0 %v2862_v10  ;;  %2445 = vmatprep.subr.bf16.mxu1 %v2864_v11 }
 0x62a   :  { %v1317_v57 = vpop.f32.mrb[10].mxu0  ;;  %v1388_v62 = vpop.f32.mrb[10].mxu1 }
 0x62b   :  { %v2510_v63 = vadd.f32 %v1317_v57, %v3050_v6  ;;  %v1319_v2 = vpop.f32.mrb[11].mxu0  ;;  %v1390_v13 = vpop.f32.mrb[11].mxu1  ;;  %v2526_v25 = vadd.f32 %v1388_v62, %v3059_v34  ;;  %v1765_v57 = vld [vmem:[#allocation5 + $0x20] sm:$0xff]  ;;  %v1766_v62 = vld [vmem:[#allocation5 + $0x28] sm:$0xff] }
 0x62c   :  { %v2511_v14 = vadd.f32 %v1319_v2, %v3052_v8  ;;  %v2527_v20 = vadd.f32 %v1390_v13, %v3056_v29  ;;  %v1767_v2 = vld [vmem:[#allocation5 + $0x30] sm:$0xff]  ;;  %v1768_v13 = vld [vmem:[#allocation5 + $0x38] sm:$0xff] }
 0x62d   :  { %v1902_v16 = vmul.f32 -1.442695, %v2510_v63  ;;  %v2483_v63 = vpack.c.bf16 %v1766_v62, %v1765_v57 }
 0x62e   :  { %v1903_v18 = vmul.f32 -1.442695, %v2511_v14  ;;  %v1904_v22 = vmul.f32 -1.442695, %v2527_v20  ;;  %v2486_v14 = vpack.c.bf16 %v1768_v13, %v1767_v2 }
 0x62f   :  { %2654 = vpow2.f32 %v1902_v16  ;;  %v1769_v16 = vld [vmem:[#allocation5 + $0x40] sm:$0xff] }
 0x630   :  { %2656 = vpow2.f32 %v1903_v18  ;;  %v1770_v18 = vld [vmem:[#allocation5 + $0x48] sm:$0xff] }
 0x631   :  { %2658 = vpow2.f32 %v1904_v22  ;;  %v2489_v20 = vpack.c.bf16 %v1770_v18, %v1769_v16  ;;  %v1771_v22 = vld [vmem:[#allocation5 + $0x50] sm:$0xff] }
 0x632   :  { %2660 = vtanh.f32 %v2526_v25  ;;  %v1772_v25 = vld [vmem:[#allocation5 + $0x58] sm:$0xff] }
 0x639   :  { %v2655_v10 = vpop.eup %2654 }
 0x63a   :  { %v2657_v27 = vpop.eup %2656  ;;  %v1400_v11 = vadd.f32 1.0, %v2655_v10  ;;  %v1773_v10 = vld [vmem:[#allocation5 + $0x60] sm:$0xff] }
 0x63b   :  { %v1406_v31 = vadd.f32 1.0, %v2657_v27  ;;  %v2659_v33 = vpop.eup %2658  ;;  %v2492_v27 = vpack.c.bf16 %v1772_v25, %v1771_v22 }
 0x63c   :  { %2662 = vrcp.f32 %v1400_v11  ;;  %v2661_v38 = vpop.eup %2660  ;;  %v1413_v46 = vadd.f32 1.0, %v2659_v33  ;;  %v1774_v11 = vld [vmem:[#allocation5 + $0x68] sm:$0xff]  ;;  %v1775_v33 = vld [vmem:[#allocation5 + $0x70] sm:$0xff] }
 0x63d   :  { %2664 = vrcp.f32 %v1406_v31  ;;  %v2495_v31 = vpack.c.bf16 %v1774_v11, %v1773_v10 }
 0x63e   :  { %2666 = vrcp.f32 %v1413_v46 }
 0x646   :  { %v2663_v39 = vpop.eup %2662 }
 0x647   :  { %v2665_v42 = vpop.eup %2664  ;;  %v1417_v43 = vmul.f32 %v2663_v39, %v2661_v38  ;;  %v1776_v38 = vld [vmem:[#allocation5 + $0x78] sm:$0xff] }
 0x648   :  { %v1416_v47 = vmul.f32 %v2665_v42, %v3230_v55  ;;  %v2667_v51 = vpop.eup %2666  ;;  %v1763_v55 = vld [vmem:[#allocation5 + $0x10] sm:$0xff]  ;;  %v2498_v39 = vpack.c.bf16 %v1776_v38, %v1775_v33 }
 0x649   :  { %v2480_v9 = vpack.c.bf16 %v1764_v5, %v1763_v55 }
 0x64a   :  { %v3272_v50 = vadd.f32 %v1417_v43, %v1416_v47 }
 0x64c   :  { %2668 = vtanh.f32 %v3272_v50 }
 0x656   :  { %v2669_v52 = vpop.eup %2668 }
 0x657   :  { %v1420_v3 = vmul.f32 %v2669_v52, %v2667_v51 }
 0x659   :  { %1486 = vmatmul.mubr.f32.vlgmr.msra.gmra.mrb[12].mxu0 %v1420_v3  ;;  %1557 = vmatmul.mubr.f32.vlgmr.msra.gmra.mrb[12].mxu1 %v1420_v3 }
 0x65a   :  { %2415 = vmatpush1.bf16.msra.mxu0 %v2866_v15  ;;  %2447 = vmatpush1.bf16.msra.mxu1 %v2875_v19 }
 0x65b   :  { %2417 = vmatprep.subr.bf16.mxu0 %v2878_v23  ;;  %2449 = vmatprep.subr.bf16.mxu1 %v2880_v24 }
 0x65c   :  { %1655 = vmatprep.mubr.f32.mxu0 %v2780_v0  ;;  %1726 = vmatprep.mubr.f32.mxu1 %v2780_v0 }
 0x65e   :  { %2419 = vmatpush1.bf16.msra.mxu0 %v2884_v28  ;;  %2451 = vmatpush1.bf16.msra.mxu1 %v2891_v32 }
 0x65f   :  { %2421 = vmatprep.subr.bf16.mxu0 %v2895_v36  ;;  %2453 = vmatprep.subr.bf16.mxu1 %v2897_v37 }
 0x662   :  { %2423 = vmatpush1.bf16.msra.mxu0 %v2901_v41  ;;  %2455 = vmatpush1.bf16.msra.mxu1 %v2908_v45 }
 0x663   :  { %2425 = vmatprep.subr.bf16.mxu0 %v2912_v49  ;;  %2457 = vmatprep.subr.bf16.mxu1 %v2916_v53 }
 0x666   :  { %2427 = vmatpush1.bf16.msra.mxu0 %v2920_v56  ;;  %2459 = vmatpush1.bf16.msra.mxu1 %v2924_v60 }
 0x667   :  { %2429 = vmatprep.subr.bf16.mxu0 %v2931_v1  ;;  %2461 = vmatprep.subr.bf16.mxu1 %v2935_v4 }
 0x66a   :  { %2431 = vmatpush1.bf16.msra.mxu0 %v2939_v7  ;;  %2463 = vmatpush1.bf16.msra.mxu1 %v2943_v12 }
 0x66b   :  { %2433 = vmatprep.subr.bf16.mxu0 %v2950_v17  ;;  %2465 = vmatprep.subr.bf16.mxu1 %v2954_v21 }
 0x66e   :  { %2435 = vmatpush1.bf16.msra.mxu0 %v2958_v26  ;;  %2467 = vmatpush1.bf16.msra.mxu1 %v2962_v30 }
 0x66f   :  { %2437 = vmatprep.subr.bf16.mxu0 %v2969_v35  ;;  %2469 = vmatprep.subr.bf16.mxu1 %v2973_v40 }
 0x672   :  { %2439 = vmatpush1.bf16.msra.mxu0 %v2977_v44  ;;  %2471 = vmatpush1.bf16.msra.mxu1 %v2981_v48 }
 0x673   :  { %2441 = vmatprep.subr.bf16.mxu0 %v2988_v54  ;;  %2473 = vmatprep.subr.bf16.mxu1 %v2992_v58  ;;  %v1761_v54 = vld [vmem:[#allocation5] sm:$0xff]  ;;  %v1762_v58 = vld [vmem:[#allocation5 + $0x8] sm:$0xff] }
 0x676   :  { %2443 = vmatpush1.bf16.msra.mxu0 %v2996_v59  ;;  %2475 = vmatpush1.bf16.msra.mxu1 %v3000_v61  ;;  %v2477_v59 = vpack.c.bf16 %v1762_v58, %v1761_v54  ;;  %v2781_v61 = vmov 0.0|0.0  }
 0x677   :  { %2476 = vmatprep.subr.bf16.mxu0 %v2781_v61 }
 0x72c   :  { %v1487_v15 = vpop.f32.mrb[12].mxu0  ;;  %v1558_v19 = vpop.f32.mrb[12].mxu1 }
 0x72d   :  { %v2512_v23 = vadd.f32 %v1487_v15, %v3050_v6  ;;  %v1489_v24 = vpop.f32.mrb[13].mxu0  ;;  %v1560_v28 = vpop.f32.mrb[13].mxu1  ;;  %v2528_v49 = vadd.f32 %v1558_v19, %v3059_v34 }
 0x72e   :  { %v2513_v32 = vadd.f32 %v1489_v24, %v3052_v8  ;;  %v2529_v41 = vadd.f32 %v1560_v28, %v3056_v29 }
 0x72f   :  { %v1905_v36 = vmul.f32 -1.442695, %v2512_v23 }
 0x730   :  { %v1906_v37 = vmul.f32 -1.442695, %v2513_v32  ;;  %v1907_v45 = vmul.f32 -1.442695, %v2529_v41 }
 0x731   :  { %2670 = vpow2.f32 %v1905_v36 }
 0x732   :  { %2672 = vpow2.f32 %v1906_v37 }
 0x733   :  { %2674 = vpow2.f32 %v1907_v45 }
 0x734   :  { %2676 = vtanh.f32 %v2528_v49 }
 0x73b   :  { %v2671_v53 = vpop.eup %2670 }
 0x73c   :  { %v2673_v56 = vpop.eup %2672  ;;  %v1570_v60 = vadd.f32 1.0, %v2671_v53 }
 0x73d   :  { %v1576_v1 = vadd.f32 1.0, %v2673_v56  ;;  %v2675_v4 = vpop.eup %2674 }
 0x73e   :  { %2678 = vrcp.f32 %v1570_v60  ;;  %v2677_v7 = vpop.eup %2676  ;;  %v1583_v26 = vadd.f32 1.0, %v2675_v4  ;;  %v1911_v60 = vld [vmem:[%s3341_s5] ss:$0 sm:$0xff] }
 0x73f   :  { %2680 = vrcp.f32 %v1576_v1 }
 0x740   :  { %2682 = vrcp.f32 %v1583_v26 }
 0x748   :  { %v2679_v12 = vpop.eup %2678 }
 0x749   :  { %v2681_v17 = vpop.eup %2680  ;;  %v1587_v21 = vmul.f32 %v2679_v12, %v2677_v7 }
 0x74a   :  { %v1586_v30 = vmul.f32 %v2681_v17, %v3272_v50  ;;  %v2683_v40 = vpop.eup %2682 }
 0x74c   :  { %v3312_v35 = vadd.f32 %v1587_v21, %v1586_v30 }
 0x74e   :  { %2684 = vtanh.f32 %v3312_v35 }
 0x758   :  { %v2685_v44 = vpop.eup %2684 }
 0x759   :  { %v1590_v48 = vmul.f32 %v2685_v44, %v2683_v40 }
 0x75b   :  { %1656 = vmatmul.mubr.f32.vlgmr.msra.gmra.mrb[14].mxu0 %v1590_v48  ;;  %1727 = vmatmul.mubr.f32.vlgmr.msra.gmra.mrb[14].mxu1 %v1590_v48 }
 0x75c   :  { %2478 = vmatpush3.bf16.msra.mxu0 %v2477_v59  ;;  %1961 = vmatprep.mubr.msk.f32.mxu0 %vm2782_vm1, %v2780_v0 }
 0x75d   :  { %2479 = vmatprep.subr.bf16.mxu0 %v2781_v61 }
 0x760   :  { %2481 = vmatpush3.bf16.msra.mxu0 %v2480_v9 }
 0x761   :  { %2482 = vmatprep.subr.bf16.mxu0 %v2781_v61 }
 0x764   :  { %2484 = vmatpush3.bf16.msra.mxu0 %v2483_v63 }
 0x765   :  { %2485 = vmatprep.subr.bf16.mxu0 %v2781_v61 }
 0x768   :  { %2487 = vmatpush3.bf16.msra.mxu0 %v2486_v14 }
 0x769   :  { %2488 = vmatprep.subr.bf16.mxu0 %v2781_v61 }
 0x76c   :  { %2490 = vmatpush3.bf16.msra.mxu0 %v2489_v20 }
 0x76d   :  { %2491 = vmatprep.subr.bf16.mxu0 %v2781_v61 }
 0x770   :  { %2493 = vmatpush3.bf16.msra.mxu0 %v2492_v27 }
 0x771   :  { %2494 = vmatprep.subr.bf16.mxu0 %v2781_v61 }
 0x774   :  { %2496 = vmatpush3.bf16.msra.mxu0 %v2495_v31 }
 0x775   :  { %2497 = vmatprep.subr.bf16.mxu0 %v2781_v61 }
 0x778   :  { %2499 = vmatpush3.bf16.msra.mxu0 %v2498_v39 }
 0x82e   :  { %v1657_v42 = vpop.f32.mrb[14].mxu0  ;;  %v1728_v43 = vpop.f32.mrb[14].mxu1 }
 0x82f   :  { %v2514_v46 = vadd.f32 %v1657_v42, %v3050_v6  ;;  %v1659_v47 = vpop.f32.mrb[15].mxu0  ;;  %v1730_v50 = vpop.f32.mrb[15].mxu1  ;;  %v2530_v19 = vadd.f32 %v1728_v43, %v3059_v34 }
 0x830   :  { %v2515_v51 = vadd.f32 %v1659_v47, %v3052_v8  ;;  %v2531_v0 = vadd.f32 %v1730_v50, %v3056_v29 }
 0x831   :  { %v1908_v52 = vmul.f32 -1.442695, %v2514_v46 }
 0x832   :  { %v1909_v3 = vmul.f32 -1.442695, %v2515_v51  ;;  %v1910_v15 = vmul.f32 -1.442695, %v2531_v0 }
 0x833   :  { %2686 = vpow2.f32 %v1908_v52 }
 0x834   :  { %2688 = vpow2.f32 %v1909_v3 }
 0x835   :  { %2690 = vpow2.f32 %v1910_v15 }
 0x836   :  { %2692 = vtanh.f32 %v2530_v19 }
 0x83d   :  { %v2687_v23 = vpop.eup %2686 }
 0x83e   :  { %v2689_v24 = vpop.eup %2688  ;;  %v1740_v28 = vadd.f32 1.0, %v2687_v23 }
 0x83f   :  { %v1746_v32 = vadd.f32 1.0, %v2689_v24  ;;  %v2691_v6 = vpop.eup %2690 }
 0x840   :  { %2694 = vrcp.f32 %v1740_v28  ;;  %v2693_v36 = vpop.eup %2692  ;;  %v1753_v45 = vadd.f32 1.0, %v2691_v6 }
 0x841   :  { %2696 = vrcp.f32 %v1746_v32 }
 0x842   :  { %2698 = vrcp.f32 %v1753_v45 }
 0x84a   :  { %v2695_v8 = vpop.eup %2694 }
 0x84b   :  { %v2697_v37 = vpop.eup %2696  ;;  %v1757_v41 = vmul.f32 %v2695_v8, %v2693_v36 }
 0x84c   :  { %v1756_v49 = vmul.f32 %v2697_v37, %v3312_v35  ;;  %v2699_v34 = vpop.eup %2698 }
 0x84e   :  { %v1758_v29 = vadd.f32 %v1757_v41, %v1756_v49 }
 0x850   :  { %2700 = vtanh.f32 %v1758_v29 }
 0x85a   :  { %v2701_v53 = vpop.eup %2700 }
 0x85b   :  { %v1760_v56 = vmul.f32 %v2701_v53, %v2699_v34 }
 0x85d   :  { %1962 = vmatmul.mubr.f32.vlgmr.msra.gmra.mrb[16].mxu0 %v1760_v56 }
 0x930   :  { %v1850_v1 = vpop.f32.mrb[16].mxu0 }
 0x931   :  { %v1851_v4 = vadd.f32 %v1911_v60, %v1850_v1  ;;  %v1963_v7 = vpop.f32.mrb[17].mxu0 }
 0x933   :  { %1854 = vst [vmem:[#allocation7] sm:$0xff] %v1851_v4 }
 0x934   :  { %2757 = shalt.err (!%p2754_p6)
}
 0x935   :  { %s2758_s28 = scalar_lea.hbm %s3342_s6, 128 }
 0x936   :  { %p2759_p7 = scmp.ne.s32.totalorder %s3342_s6, %s2758_s28  ;;  %p2762_p8 = scmp.lt.u32.totalorder %s2758_s28, %s3342_s6 }
 0x938   :  { %p2764_p9 = pnand %p2762_p8, %p2759_p7 }
 0x93a   :  { %2767 = shalt.err (!%p2764_p9)
}
 0x93b   :  { %1864 = dma.vmem_to_hbm [thread:$0]  %s1862_s24, 128, %s3342_s6, [#allocation4]  }
 0x93c   :  { %2772 = dma.done.wait [#allocation4], 128  }
 0x93d   :  { %2773 = vsyncadd [#allocation4], 4294967168 }
 0x93e   :  { %1868 = vsyncpa [#allocation3], 1 }
 0x93f   :  { %1869 = vsyncpa [#allocation6], 1 }
 0x940   :  { %1870 = vsyncpa [#allocation4], 1 }

</bundles_post_ra>
